<compile_context>
chip_gen: v7x
topology: tpu7x:2x2x1
jax: 0.10.0
libtpu: 0.0.40
codegen_flags: <defaults>
</compile_context>

<pallas_src>
import functools

import jax
import jax.numpy as jnp
from jax.experimental import pallas as pl
from jax.experimental.pallas import tpu as pltpu


def _round_up(x, m):
    return (x + m - 1) // m * m


def _vmem_capacity_bytes():
    """Physical VMEM per TensorCore; conservative fallback if the query fails."""
    try:
        info = pltpu.get_tpu_info()
        for attr in ("vmem_capacity_bytes", "vmem_bytes", "vmem_size_bytes"):
            v = getattr(info, attr, None)
            if v:
                return int(v)
    except Exception:
        pass
    return 64 * 1024 * 1024


_VMEM_CAP = _vmem_capacity_bytes()
# Generation-aware scoped-VMEM limit: ~96 MiB on 128-MiB parts (v5e/v6e),
# ~48 MiB on 64-MiB parts (v7x).
_VMEM_LIMIT = min(_VMEM_CAP - 8 * 1024 * 1024,
                  max(32 * 1024 * 1024, int(_VMEM_CAP * 0.75)))
_MOSAIC = functools.partial(pltpu.CompilerParams, vmem_limit_bytes=_VMEM_LIMIT)


# ----------------------------------------------------------------------------
# Fused 3x3 stride-1 convolution (direct; unpadded NHWC input + tiny row halo)
# ----------------------------------------------------------------------------
def _conv3x3_kernel(x_ref, halo_ref, w_ref, b_ref, o_ref, xpad_ref, *,
                    rows, width, dil, relu):
    """Direct 3x3/s1 conv on a row slab: 9 shifted bf16 matmuls, f32 acc."""
    cin = x_ref.shape[-1]
    tco = o_ref.shape[-1]
    # Assemble the zero-padded working slab (rows+2d, width+2d, cin) in VMEM:
    # left/right zero columns, top/bottom halo rows, then the main rows.
    zcol = jnp.zeros((rows + 2 * dil, dil, cin), xpad_ref.dtype)
    xpad_ref[:, 0:dil, :] = zcol
    xpad_ref[:, dil + width:, :] = zcol
    xpad_ref[0:dil, dil:dil + width, :] = halo_ref[0:dil]
    xpad_ref[dil:dil + rows, dil:dil + width, :] = x_ref[...]
    xpad_ref[dil + rows:, dil:dil + width, :] = halo_ref[dil:2 * dil]

    acc = jnp.zeros((rows * width, tco), jnp.float32)
    for i in range(3):
        for j in range(3):
            a = xpad_ref[i * dil:i * dil + rows, j * dil:j * dil + width, :]
            a = a.reshape(rows * width, cin)
            acc = acc + jnp.dot(a, w_ref[i * 3 + j],
                                preferred_element_type=jnp.float32)
    out = acc + b_ref[...]
    if relu:
        out = jnp.maximum(out, 0.0)
    o_ref[...] = out.astype(o_ref.dtype)


def _pick_conv_rows(H, W, Cin, Cout, dil):
    """Largest divisor of H whose per-step VMEM working set fits the budget."""
    budget = int(_VMEM_LIMIT * 0.45)
    tco = min(Cout, 512)
    sub_in = _round_up(W, 16)
    sub_pad = _round_up(W + 2 * dil, 16)
    lane_in = _round_up(Cin, 128)
    lane_out = _round_up(tco, 128)

    def fp(t):
        slab = t * sub_in * lane_in * 2                  # main input block
        halo = 2 * dil * sub_in * lane_in * 2
        wts = 9 * Cin * tco * 2
        outb = _round_up(t * W, 16) * lane_out * 2
        acc = _round_up(t * W, 16) * lane_out * 4
        padded = (t + 2 * dil) * sub_pad * lane_in * 2   # VMEM scratch slab
        tap = _round_up(t * W, 16) * lane_in * 2
        # inputs/outputs double-buffered; scratch/temps single
        return 2 * (slab + halo + wts + outb) + padded + tap + 2 * acc

    cands = [t for t in range(H, 0, -1)
             if H % t == 0 and t >= dil and (t == H or (t * W) % 8 == 0)]
    for t in cands:
        if fp(t) <= budget:
            return t
    return cands[-1]


def conv3x3_s1(x, wp, bp, *, dil, relu, force_tr=None):
    """x: (N,H,W,Cin) bf16 (unpadded); wp: (9,Cin,Cout) bf16; bp: (1,Cout) f32."""
    N, H, W, Cin = x.shape
    KK, _, Cout = wp.shape

    tr = force_tr if force_tr is not None else _pick_conv_rows(H, W, Cin, Cout, dil)
    nb = H // tr
    # Cout tile: split 512/1024-channel single-block layers so there are >=2
    # (parallel) grid iterations for v7x's two TensorCores.
    tco = 256 if (Cout >= 512 and nb == 1) else min(Cout, 512)
    nco = Cout // tco
    if force_tr is None and N * nco * nb < 2:
        smaller = [t for t in range(tr - 1, 0, -1)
                   if H % t == 0 and t >= dil and (t * W) % 8 == 0]
        if smaller:
            tr = smaller[0]
            nb = H // tr

    # Tiny halo side array: the dil rows above and below each row slab
    # (zeros at the image borders).  Replaces the old full-activation HBM pad
    # and the old full-slab halo read.
    if nb == 1:
        halo = jnp.zeros((N, 1, 2 * dil, W, Cin), x.dtype)
    else:
        xr = x.reshape(N, nb, tr, W, Cin)
        zrow = jnp.zeros((N, 1, dil, W, Cin), x.dtype)
        top = jnp.concatenate([zrow, xr[:, :-1, tr - dil:]], axis=1)
        bot = jnp.concatenate([xr[:, 1:, :dil], zrow], axis=1)
        halo = jnp.concatenate([top, bot], axis=2)

    kern = functools.partial(_conv3x3_kernel, rows=tr, width=W, dil=dil,
                             relu=relu)
    out = pl.pallas_call(
        kern,
        out_shape=jax.ShapeDtypeStruct((N, H * W, Cout), jnp.bfloat16),
        grid=(N, nco, nb),   # nb innermost => weight block resident across slabs
        in_specs=[
            pl.BlockSpec((None, tr, W, Cin), lambda n, c, q: (n, q, 0, 0)),
            pl.BlockSpec((None, None, 2 * dil, W, Cin),
                         lambda n, c, q: (n, q, 0, 0, 0)),
            pl.BlockSpec((KK, Cin, tco), lambda n, c, q: (0, 0, c)),
            pl.BlockSpec((1, tco), lambda n, c, q: (0, c)),
        ],
        out_specs=pl.BlockSpec((None, tr * W, tco), lambda n, c, q: (n, q, c)),
        scratch_shapes=[pltpu.VMEM((tr + 2 * dil, W + 2 * dil, Cin),
                                   jnp.bfloat16)],
        compiler_params=_MOSAIC(
            dimension_semantics=("parallel", "parallel", "parallel")),
    )(x, halo, wp, bp)
    return out.reshape(N, H, W, Cout)


# ----------------------------------------------------------------------------
# bf16 matmul + bias (+ReLU) for 1x1 convs, the RGB stem and the extra convs
# ----------------------------------------------------------------------------
def _matmul_bias_kernel(a_ref, b_ref, bias_ref, o_ref, *, relu):
    acc = jnp.dot(a_ref[...], b_ref[...], preferred_element_type=jnp.float32)
    out = acc + bias_ref[...]
    if relu:
        out = jnp.maximum(out, 0.0)
    o_ref[...] = out.astype(o_ref.dtype)


def _pick_tm(Mp):
    if Mp <= 1024:
        return Mp
    for t in range(1024, 255, -8):
        if Mp % t == 0:
            return t
    return 512


def matmul_bias(a, b, bias, *, relu, out_dtype=jnp.bfloat16):
    """(M,K)bf16 @ (K,N)bf16 + bias(1,N f32), fused ReLU, bf16 out.
    K and N are passed as full-extent blocks (no HBM padding needed)."""
    M, K = a.shape
    _, Nn = b.shape
    Mp = _round_up(M, 8)
    tm = _pick_tm(Mp)
    Mp = _round_up(Mp, tm)
    if Mp != M:
        a = jnp.pad(a, ((0, Mp - M), (0, 0)))
    tn = Nn
    if Nn > 512:
        for cand in (512, 384, 256, 128):
            if Nn % cand == 0:
                tn = cand
                break
    out = pl.pallas_call(
        functools.partial(_matmul_bias_kernel, relu=relu),
        out_shape=jax.ShapeDtypeStruct((Mp, Nn), out_dtype),
        grid=(Mp // tm, Nn // tn),
        in_specs=[pl.BlockSpec((tm, K), lambda i, j: (i, 0)),
                  pl.BlockSpec((K, tn), lambda i, j: (0, j)),
                  pl.BlockSpec((1, tn), lambda i, j: (0, j))],
        out_specs=pl.BlockSpec((tm, tn), lambda i, j: (i, j)),
        compiler_params=_MOSAIC(dimension_semantics=("parallel", "parallel")),
    )(a, b, bias)
    return out[:M] if Mp != M else out


# ----------------------------------------------------------------------------
# Max pools
# ----------------------------------------------------------------------------
def _pool2x2_kernel(x_ref, o_ref, *, C):
    x = x_ref[...]                                      # (2*tro, Wo, 2C)
    r, w2, c2 = x.shape
    x = jnp.max(x.reshape(r // 2, 2, w2, c2), axis=1)   # row pairs
    o_ref[...] = jnp.maximum(x[..., :C], x[..., C:])    # column pairs


def _pick_pool_rows(Ho, Wo, C):
    budget = _VMEM_LIMIT // 3
    sub = _round_up(Wo, 16)
    lane_in = _round_up(2 * C, 128)
    lane_out = _round_up(C, 128)

    def fp(t):
        return 2 * (2 * t * sub * lane_in * 2 + t * sub * lane_out * 2)

    for t in range(Ho, 0, -1):
        if Ho % t == 0 and fp(t) <= budget:
            return t
    return 1


def max_pool2x2_s2(x):
    """MaxPool2d(kernel=2, stride=2, ceil_mode=True) on NHWC bf16."""
    N, H, W, C = x.shape
    Ho = -(-H // 2)
    Wo = -(-W // 2)
    if H != 2 * Ho or W != 2 * Wo:
        x = jnp.pad(x, ((0, 0), (0, 2 * Ho - H), (0, 2 * Wo - W), (0, 0)),
                    constant_values=-jnp.inf)
    xr = x.reshape(N, 2 * Ho, Wo, 2 * C)        # free reshape: W pairs -> lanes
    tro = _pick_pool_rows(Ho, Wo, C)
    nb = Ho // tro
    return pl.pallas_call(
        functools.partial(_pool2x2_kernel, C=C),
        out_shape=jax.ShapeDtypeStruct((N, Ho, Wo, C), x.dtype),
        grid=(N, nb),
        in_specs=[pl.BlockSpec((None, 2 * tro, Wo, 2 * C),
                               lambda n, q: (n, q, 0, 0))],
        out_specs=pl.BlockSpec((None, tro, Wo, C), lambda n, q: (n, q, 0, 0)),
        compiler_params=_MOSAIC(dimension_semantics=("parallel", "parallel")),
    )(xr)


def _pool3x3_kernel(x_ref, o_ref, *, H, W):
    x = x_ref[...]
    m = x[0:H, 0:W, :]
    for i in range(3):
        for j in range(3):
            if i == 0 and j == 0:
                continue
            m = jnp.maximum(m, x[i:i + H, j:j + W, :])
    o_ref[...] = m


def max_pool3x3_s1p1(x):
    """MaxPool2d(kernel=3, stride=1, padding=1) -- only used on the 17x17 map."""
    N, H, W, C = x.shape
    xp = jnp.pad(x, ((0, 0), (1, 1), (1, 1), (0, 0)), constant_values=-jnp.inf)
    return pl.pallas_call(
        functools.partial(_pool3x3_kernel, H=H, W=W),
        out_shape=jax.ShapeDtypeStruct((N, H, W, C), x.dtype),
        grid=(N,),
        in_specs=[pl.BlockSpec((None, H + 2, W + 2, C), lambda n: (n, 0, 0, 0))],
        out_specs=pl.BlockSpec((None, H, W, C), lambda n: (n, 0, 0, 0)),
        compiler_params=_MOSAIC(dimension_semantics=("parallel",)),
    )(xp)


# ----------------------------------------------------------------------------
# L2Norm (exact, matches torch: x / (sqrt(sum(x^2)) + eps) * weight)
# ----------------------------------------------------------------------------
def _l2norm_kernel(x_ref, w_ref, o_ref):
    x = x_ref[...].astype(jnp.float32)
    ss = jnp.sum(x * x, axis=-1, keepdims=True)
    norm = jnp.sqrt(ss) + 1e-10
    o_ref[...] = (x / norm) * w_ref[...]


def l2_norm(x, weight):
    N, H, W, C = x.shape
    M = N * H * W
    nblk = 2 if M >= 1024 else 1      # >=2 blocks so v7x uses both TCs
    tm = _round_up(-(-M // nblk), 8)
    Mp = tm * nblk
    xf = x.reshape(M, C)
    if Mp != M:
        xf = jnp.pad(xf, ((0, Mp - M), (0, 0)))
    wp = weight.reshape(1, C).astype(jnp.float32)
    out = pl.pallas_call(
        _l2norm_kernel,
        out_shape=jax.ShapeDtypeStruct((Mp, C), jnp.float32),
        grid=(nblk,),
        in_specs=[pl.BlockSpec((tm, C), lambda i: (i, 0)),
                  pl.BlockSpec((1, C), lambda i: (0, 0))],
        out_specs=pl.BlockSpec((tm, C), lambda i: (i, 0)),
        compiler_params=_MOSAIC(dimension_semantics=("parallel",)),
    )(xf, wp)
    return out[:M].reshape(N, H, W, C)


# ----------------------------------------------------------------------------
# Conv dispatch + weight packing (done ONCE, outside the forward pass)
# ----------------------------------------------------------------------------
def conv_path(cfg):
    if cfg['k'] == 1 and cfg['stride'] == 1 and cfg['pad'] == 0:
        return 'c1'
    if (cfg['k'] == 3 and cfg['stride'] == 1 and cfg['pad'] == cfg['dil']
            and cfg['cin'] >= 8):
        return 'c3'
    return 'gen'


def pack_conv(w, b, cfg):
    """PyTorch (Cout,Cin,kh,kw) weights -> packed bf16 layout for the kernels."""
    cout, cin, kh, kw = w.shape
    path = conv_path(cfg)
    if path == 'c3':
        wp = jnp.transpose(w, (2, 3, 1, 0)).reshape(kh * kw, cin, cout)
        wp = wp.astype(jnp.bfloat16)
    elif path == 'c1':
        wp = jnp.transpose(w.reshape(cout, cin), (1, 0)).astype(jnp.bfloat16)
    else:
        wp = jnp.transpose(w, (2, 3, 1, 0)).reshape(kh * kw * cin, cout)
        wp = wp.astype(jnp.bfloat16)
    bp = b.reshape(1, cout).astype(jnp.float32)
    return wp, bp


def conv_im2col(x, w2, bp, cfg, relu):
    """Used for the RGB stem (K-folding, Cin=3) and the tiny extra 3x3 convs."""
    k, s, p, d = cfg['k'], cfg['stride'], cfg['pad'], cfg['dil']
    N, H, W, C = x.shape
    Ho = (H + 2 * p - d * (k - 1) - 1) // s + 1
    Wo = (W + 2 * p - d * (k - 1) - 1) // s + 1
    xp = jnp.pad(x, ((0, 0), (p, p), (p, p), (0, 0)))
    cols = []
    for i in range(k):
        for j in range(k):
            cols.append(xp[:, i * d:i * d + (Ho - 1) * s + 1:s,
                           j * d:j * d + (Wo - 1) * s + 1:s, :])
    patches = jnp.concatenate(cols, axis=-1).reshape(N * Ho * Wo, k * k * C)
    out = matmul_bias(patches, w2, bp, relu=relu)
    return out.reshape(N, Ho, Wo, w2.shape[1])


def conv2d(x, packed, cfg, relu):
    wp, bp = packed
    path = conv_path(cfg)
    if path == 'c3':
        return conv3x3_s1(x, wp, bp, dil=cfg['dil'], relu=relu)
    if path == 'c1':
        N, H, W, C = x.shape
        out = matmul_bias(x.reshape(N * H * W, C), wp, bp, relu=relu)
        return out.reshape(N, H, W, -1)
    return conv_im2col(x, wp, bp, cfg, relu)


# ----------------------------------------------------------------------------
# VGG architecture (mirrors the PyTorch module construction)
# ----------------------------------------------------------------------------
SETTING = {11: (1, 1, 2, 2, 2), 13: (2, 2, 2, 2, 2),
           16: (2, 2, 3, 3, 3), 19: (2, 2, 4, 4, 4)}
EXTRA_SETTING = {300: (256, 'S', 512, 128, 'S', 256, 128, 256, 128, 256),
                 512: (256, 'S', 512, 128, 'S', 256, 128, 'S', 256, 128, 'S', 256, 128)}


def build_arch(depth=16, input_size=300):
    features = []
    inplanes = 3
    for i, num_blocks in enumerate(SETTING[depth]):
        planes = 64 * 2 ** i if i < 4 else 512
        for _ in range(num_blocks):
            features.append(('conv', dict(cin=inplanes, cout=planes, k=3,
                                          stride=1, pad=1, dil=1)))
            features.append(('relu', None))
            inplanes = planes
        features.append(('maxpool', dict(k=2, stride=2, pad=0, ceil=True)))
    features.pop(-1)
    features.append(('maxpool', dict(k=3, stride=1, pad=1, ceil=False)))
    features.append(('conv', dict(cin=512, cout=1024, k=3, stride=1, pad=6, dil=6)))
    features.append(('relu', None))
    features.append(('conv', dict(cin=1024, cout=1024, k=1, stride=1, pad=0, dil=1)))
    features.append(('relu', None))

    extras = []
    inplanes = 1024
    num_layers, flag = 0, 0
    for plane in EXTRA_SETTING[input_size]:
        k = [1, 3][num_layers % 2]
        if plane == 'S':
            flag = 1
            continue
        if flag == 1:
            stride, padding = 2, 1
            flag = 0
        else:
            stride, padding = 1, 0
        extras.append(dict(cin=inplanes, cout=plane, k=k, stride=stride,
                           pad=padding, dil=1))
        inplanes = plane
        num_layers += 1
    return features, extras


def init_params(features, extras, key):
    def xavier(key, cout, cin, k):
        fan_in, fan_out = cin * k * k, cout * k * k
        bound = (6.0 / (fan_in + fan_out)) ** 0.5
        w = jax.random.uniform(key, (cout, cin, k, k), jnp.float32, -bound, bound)
        b = jnp.zeros((cout,), jnp.float32)
        return w, b

    feat_params, extra_params = [], []
    for kind, cfg in features:
        if kind == 'conv':
            key, sub = jax.random.split(key)
            feat_params.append(xavier(sub, cfg['cout'], cfg['cin'], cfg['k']))
    for cfg in extras:
        key, sub = jax.random.split(key)
        extra_params.append(xavier(sub, cfg['cout'], cfg['cin'], cfg['k']))
    l2_weight = jnp.full((512,), 20.0, jnp.float32)   # L2Norm(512, scale=20)
    return feat_params, extra_params, l2_weight


def vgg_forward(x_nchw, feat_packed, extra_packed, l2_weight, *,
                features, extras, out_feature_indices=(22, 34)):
    x = jnp.transpose(x_nchw, (0, 2, 3, 1)).astype(jnp.bfloat16)  # NCHW -> NHWC
    outs = []
    pi = 0
    i = 0
    n_feat = len(features)
    while i < n_feat:
        kind, cfg = features[i]
        if kind == 'conv':
            packed = feat_packed[pi]
            pi += 1
            # fuse the trailing ReLU into the conv unless the conv output
            # itself is one of the requested feature maps
            fuse = (i + 1 < n_feat and features[i + 1][0] == 'relu'
                    and i not in out_feature_indices)
            x = conv2d(x, packed, cfg, relu=fuse)
            if i in out_feature_indices:
                outs.append(x)
            if fuse:
                i += 1
                if i in out_feature_indices:
                    outs.append(x)
            i += 1
            continue
        elif kind == 'relu':
            x = jnp.maximum(x, 0).astype(x.dtype)
        elif kind == 'maxpool':
            if cfg['k'] == 2 and cfg['stride'] == 2 and cfg['pad'] == 0:
                x = max_pool2x2_s2(x)
            elif cfg['k'] == 3 and cfg['stride'] == 1 and cfg['pad'] == 1:
                x = max_pool3x3_s1p1(x)
            else:
                # TODO(synk): generic max-pool configs are not needed by this module.
                raise NotImplementedError("unsupported pool config")
        if i in out_feature_indices:
            outs.append(x)
        i += 1

    for j, cfg in enumerate(extras):
        x = conv2d(x, extra_packed[j], cfg, relu=True)  # F.relu in forward
        if j % 2 == 1:
            outs.append(x)

    outs[0] = l2_norm(outs[0], l2_weight)
    # back to NCHW / f32 to match the PyTorch module's outputs
    return tuple(jnp.transpose(o.astype(jnp.float32), (0, 3, 1, 2)) for o in outs)


if __name__ == "__main__":
    key = jax.random.PRNGKey(0)
    k = jax.random.split(key, 16)

    # ---- kernel correctness probes (compared against XLA references) -------
    def conv_ref(x, w, b, *, stride=1, pad=1, dil=1, relu=False):
        out = jax.lax.conv_general_dilated(
            x, jnp.transpose(w, (2, 3, 1, 0)), (stride, stride),
            ((pad, pad), (pad, pad)), rhs_dilation=(dil, dil),
            dimension_numbers=('NHWC', 'HWIO', 'NHWC')) + b
        return jnp.maximum(out, 0.0) if relu else out

    def check(got, ref, tol=0.05):
        err = float(jnp.max(jnp.abs(got.astype(jnp.float32) - ref)))
        scale = float(jnp.max(jnp.abs(ref))) + 1e-6
        assert err / scale < tol, (err, scale)

    # 1) direct 3x3 conv, auto row blocking (exercises zero-halo image edges)
    cx = jax.random.normal(k[0], (1, 16, 16, 64), jnp.float32) * 0.5
    cw = jax.random.normal(k[1], (128, 64, 3, 3), jnp.float32) * 0.05
    cb = jax.random.normal(k[2], (128,), jnp.float32) * 0.1
    cfg = dict(cin=64, cout=128, k=3, stride=1, pad=1, dil=1)
    got = conv2d(cx.astype(jnp.bfloat16), pack_conv(cw, cb, cfg), cfg, relu=True)
    check(got, conv_ref(cx, cw, cb, relu=True))

    # 2) multi-row-slab halo path (forced 4 row blocks)
    cx2 = jax.random.normal(k[3], (1, 32, 32, 64), jnp.float32) * 0.3
    cw2 = jax.random.normal(k[4], (128, 64, 3, 3), jnp.float32) * 0.05
    cb2 = jnp.zeros((128,), jnp.float32)
    wp2, bp2 = pack_conv(cw2, cb2, cfg)
    got2 = conv3x3_s1(cx2.astype(jnp.bfloat16), wp2, bp2, dil=1, relu=False,
                      force_tr=8)
    check(got2, conv_ref(cx2, cw2, cb2))

    # 3) dilated (fc6-style) conv
    cx3 = jax.random.normal(k[5], (1, 16, 16, 64), jnp.float32) * 0.3
    cw3 = jax.random.normal(k[6], (64, 64, 3, 3), jnp.float32) * 0.05
    cb3 = jax.random.normal(k[7], (64,), jnp.float32) * 0.1
    cfg3 = dict(cin=64, cout=64, k=3, stride=1, pad=6, dil=6)
    got3 = conv2d(cx3.astype(jnp.bfloat16), pack_conv(cw3, cb3, cfg3), cfg3,
                  relu=False)
    check(got3, conv_ref(cx3, cw3, cb3, pad=6, dil=6))

    # 4) RGB stem path (K-folded im2col + matmul, Cin=3)
    cx4 = jax.random.normal(k[8], (1, 16, 16, 3), jnp.float32) * 0.5
    cw4 = jax.random.normal(k[9], (32, 3, 3, 3), jnp.float32) * 0.1
    cb4 = jax.random.normal(k[10], (32,), jnp.float32) * 0.1
    cfg4 = dict(cin=3, cout=32, k=3, stride=1, pad=1, dil=1)
    got4 = conv2d(cx4.astype(jnp.bfloat16), pack_conv(cw4, cb4, cfg4), cfg4,
                  relu=True)
    check(got4, conv_ref(cx4, cw4, cb4, relu=True))

    # 5) 2x2/s2 max pool
    px = jax.random.normal(k[11], (1, 20, 20, 64), jnp.float32).astype(jnp.bfloat16)
    gp = max_pool2x2_s2(px).astype(jnp.float32)
    rp = jax.lax.reduce_window(px.astype(jnp.float32), -jnp.inf, jax.lax.max,
                               (1, 2, 2, 1), (1, 2, 2, 1), 'VALID')
    assert float(jnp.max(jnp.abs(gp - rp))) < 1e-5

    # ---- full VGG-16 (SSD300 style) forward ---------------------------------
    depth, input_size = 16, 300
    features, extras = build_arch(depth, input_size)
    key, pkey, xkey = jax.random.split(key, 3)
    feat_params, extra_params, l2_weight = init_params(features, extras, pkey)

    # pack / transpose / cast weights ONCE, outside the forward pass
    feat_cfgs = [cfg for kind, cfg in features if kind == 'conv']
    feat_packed = [pack_conv(w, b, c) for (w, b), c in zip(feat_params, feat_cfgs)]
    extra_packed = [pack_conv(w, b, c) for (w, b), c in zip(extra_params, extras)]

    # Smallest spatial size for which the full SSD300 extra-layer chain is
    # valid (needs ceil(H/16) >= 17); batch kept at 1 to stay small.
    x = jax.random.normal(xkey, (1, 3, 272, 272), jnp.float32)

    fwd = jax.jit(functools.partial(vgg_forward, features=features, extras=extras))
    outs = jax.block_until_ready(fwd(x, feat_packed, extra_packed, l2_weight))

    expected = [(1, 512, 34, 34), (1, 1024, 17, 17), (1, 512, 9, 9),
                (1, 256, 5, 5), (1, 256, 3, 3), (1, 256, 1, 1)]
    assert [tuple(o.shape) for o in outs] == expected, [o.shape for o in outs]
    assert all(bool(jnp.all(jnp.isfinite(o))) for o in outs)
    print("KERNEL_OK")
</pallas_src>

<mosaic_0001>
module attributes {stable_mosaic.version = 11 : i64} {
  func.func @_conv3x3_kernel(%arg0: i32, %arg1: i32, %arg2: i32, %arg3: memref<1x8x16x64xbf16, #tpu.memory_space<vmem>>, %arg4: memref<1x1x2x16x64xbf16, #tpu.memory_space<vmem>>, %arg5: memref<9x64x128xbf16, #tpu.memory_space<vmem>>, %arg6: memref<1x128xf32, #tpu.memory_space<vmem>>, %arg7: memref<1x128x128xbf16, #tpu.memory_space<vmem>>, %arg8: memref<10x18x64xbf16, #tpu.memory_space<vmem>>) attributes {dimension_semantics = [#tpu.dimension_semantics<parallel>, #tpu.dimension_semantics<parallel>, #tpu.dimension_semantics<parallel>], iteration_bounds = array<i64: 1, 1, 2>, scalar_prefetch = 0 : i64, scratch_operands = 1 : i64, tpu.core_type = #tpu.core_type<tc>, window_params = [{transform_indices = @transform_0, window_bounds = array<i64: 1, 8, 16, 64>}, {transform_indices = @transform_1, window_bounds = array<i64: 1, 1, 2, 16, 64>}, {transform_indices = @transform_2, window_bounds = array<i64: 9, 64, 128>}, {transform_indices = @transform_3, window_bounds = array<i64: 1, 128>}, {transform_indices = @transform_4, window_bounds = array<i64: 1, 128, 128>}]} {
    %cst = arith.constant 0.000000e+00 : bf16
    %0 = vector.broadcast %cst : bf16 to vector<10x1x64xbf16>
    %c0 = arith.constant 0 : index
    %c0_0 = arith.constant 0 : index
    %c0_1 = arith.constant 0 : index
    %1 = vector.load %arg8[%c0, %c0_0, %c0_1] : memref<10x18x64xbf16, #tpu.memory_space<vmem>>, vector<10x1x64xbf16>
    tpu.vector_store %arg8[%c0, %c0_0, %c0_1], %0 {strides = array<i32>} : memref<10x18x64xbf16, #tpu.memory_space<vmem>>, vector<10x1x64xbf16>,
    %c0_2 = arith.constant 0 : index
    %c17 = arith.constant 17 : index
    %c0_3 = arith.constant 0 : index
    %2 = vector.load %arg8[%c0_2, %c17, %c0_3] : memref<10x18x64xbf16, #tpu.memory_space<vmem>>, vector<10x1x64xbf16>
    tpu.vector_store %arg8[%c0_2, %c17, %c0_3], %0 {strides = array<i32>} : memref<10x18x64xbf16, #tpu.memory_space<vmem>>, vector<10x1x64xbf16>,
    %c0_4 = arith.constant 0 : index
    %c0_5 = arith.constant 0 : index
    %c0_6 = arith.constant 0 : index
    %c0_7 = arith.constant 0 : index
    %c0_8 = arith.constant 0 : index
    %3 = vector.load %arg4[%c0_4, %c0_5, %c0_6, %c0_7, %c0_8] : memref<1x1x2x16x64xbf16, #tpu.memory_space<vmem>>, vector<1x1x1x16x64xbf16>
    %4 = vector.shape_cast %3 : vector<1x1x1x16x64xbf16> to vector<1x16x64xbf16>
    %c0_9 = arith.constant 0 : index
    %c1 = arith.constant 1 : index
    %c0_10 = arith.constant 0 : index
    %5 = vector.load %arg8[%c0_9, %c1, %c0_10] : memref<10x18x64xbf16, #tpu.memory_space<vmem>>, vector<1x16x64xbf16>
    tpu.vector_store %arg8[%c0_9, %c1, %c0_10], %4 {strides = array<i32>} : memref<10x18x64xbf16, #tpu.memory_space<vmem>>, vector<1x16x64xbf16>,
    %c0_11 = arith.constant 0 : index
    %c0_12 = arith.constant 0 : index
    %c0_13 = arith.constant 0 : index
    %c0_14 = arith.constant 0 : index
    %6 = vector.load %arg3[%c0_11, %c0_12, %c0_13, %c0_14] : memref<1x8x16x64xbf16, #tpu.memory_space<vmem>>, vector<1x8x16x64xbf16>
    %7 = vector.shape_cast %6 : vector<1x8x16x64xbf16> to vector<8x16x64xbf16>
    %c1_15 = arith.constant 1 : index
    %c1_16 = arith.constant 1 : index
    %c0_17 = arith.constant 0 : index
    %8 = vector.load %arg8[%c1_15, %c1_16, %c0_17] : memref<10x18x64xbf16, #tpu.memory_space<vmem>>, vector<8x16x64xbf16>
    tpu.vector_store %arg8[%c1_15, %c1_16, %c0_17], %7 {strides = array<i32>} : memref<10x18x64xbf16, #tpu.memory_space<vmem>>, vector<8x16x64xbf16>,
    %c0_18 = arith.constant 0 : index
    %c0_19 = arith.constant 0 : index
    %c1_20 = arith.constant 1 : index
    %c0_21 = arith.constant 0 : index
    %c0_22 = arith.constant 0 : index
    %9 = vector.load %arg4[%c0_18, %c0_19, %c1_20, %c0_21, %c0_22] : memref<1x1x2x16x64xbf16, #tpu.memory_space<vmem>>, vector<1x1x1x16x64xbf16>
    %10 = vector.shape_cast %9 : vector<1x1x1x16x64xbf16> to vector<1x16x64xbf16>
    %c9 = arith.constant 9 : index
    %c1_23 = arith.constant 1 : index
    %c0_24 = arith.constant 0 : index
    %11 = vector.load %arg8[%c9, %c1_23, %c0_24] : memref<10x18x64xbf16, #tpu.memory_space<vmem>>, vector<1x16x64xbf16>
    tpu.vector_store %arg8[%c9, %c1_23, %c0_24], %10 {strides = array<i32>} : memref<10x18x64xbf16, #tpu.memory_space<vmem>>, vector<1x16x64xbf16>,
    %cst_25 = arith.constant 0.000000e+00 : f32
    %12 = vector.broadcast %cst_25 : f32 to vector<128x128xf32>
    %c0_26 = arith.constant 0 : index
    %c0_27 = arith.constant 0 : index
    %c0_28 = arith.constant 0 : index
    %13 = vector.load %arg8[%c0_26, %c0_27, %c0_28] : memref<10x18x64xbf16, #tpu.memory_space<vmem>>, vector<8x16x64xbf16>
    %14 = vector.shape_cast %13 : vector<8x16x64xbf16> to vector<128x64xbf16>
    %c0_29 = arith.constant 0 : index
    %c0_30 = arith.constant 0 : index
    %c0_31 = arith.constant 0 : index
    %15 = vector.load %arg5[%c0_29, %c0_30, %c0_31] : memref<9x64x128xbf16, #tpu.memory_space<vmem>>, vector<1x64x128xbf16>
    %16 = vector.shape_cast %15 : vector<1x64x128xbf16> to vector<64x128xbf16>
    %cst_32 = arith.constant dense<0.000000e+00> : vector<128x128xf32>
    %17 = tpu.matmul %14, %16, %cst_32 {dimension_numbers = #tpu.dot_dimension_numbers<[1], [0], [0], [1], [0, 0, 1, 1], [], []>} : vector<128x64xbf16>, vector<64x128xbf16>, vector<128x128xf32> -> vector<128x128xf32>
    %18 = arith.addf %12, %17 : vector<128x128xf32>
    %c0_33 = arith.constant 0 : index
    %c1_34 = arith.constant 1 : index
    %c0_35 = arith.constant 0 : index
    %19 = vector.load %arg8[%c0_33, %c1_34, %c0_35] : memref<10x18x64xbf16, #tpu.memory_space<vmem>>, vector<8x16x64xbf16>
    %20 = vector.shape_cast %19 : vector<8x16x64xbf16> to vector<128x64xbf16>
    %c1_36 = arith.constant 1 : index
    %c0_37 = arith.constant 0 : index
    %c0_38 = arith.constant 0 : index
    %21 = vector.load %arg5[%c1_36, %c0_37, %c0_38] : memref<9x64x128xbf16, #tpu.memory_space<vmem>>, vector<1x64x128xbf16>
    %22 = vector.shape_cast %21 : vector<1x64x128xbf16> to vector<64x128xbf16>
    %cst_39 = arith.constant dense<0.000000e+00> : vector<128x128xf32>
    %23 = tpu.matmul %20, %22, %cst_39 {dimension_numbers = #tpu.dot_dimension_numbers<[1], [0], [0], [1], [0, 0, 1, 1], [], []>} : vector<128x64xbf16>, vector<64x128xbf16>, vector<128x128xf32> -> vector<128x128xf32>
    %24 = arith.addf %18, %23 : vector<128x128xf32>
    %c0_40 = arith.constant 0 : index
    %c2 = arith.constant 2 : index
    %c0_41 = arith.constant 0 : index
    %25 = vector.load %arg8[%c0_40, %c2, %c0_41] : memref<10x18x64xbf16, #tpu.memory_space<vmem>>, vector<8x16x64xbf16>
    %26 = vector.shape_cast %25 : vector<8x16x64xbf16> to vector<128x64xbf16>
    %c2_42 = arith.constant 2 : index
    %c0_43 = arith.constant 0 : index
    %c0_44 = arith.constant 0 : index
    %27 = vector.load %arg5[%c2_42, %c0_43, %c0_44] : memref<9x64x128xbf16, #tpu.memory_space<vmem>>, vector<1x64x128xbf16>
    %28 = vector.shape_cast %27 : vector<1x64x128xbf16> to vector<64x128xbf16>
    %cst_45 = arith.constant dense<0.000000e+00> : vector<128x128xf32>
    %29 = tpu.matmul %26, %28, %cst_45 {dimension_numbers = #tpu.dot_dimension_numbers<[1], [0], [0], [1], [0, 0, 1, 1], [], []>} : vector<128x64xbf16>, vector<64x128xbf16>, vector<128x128xf32> -> vector<128x128xf32>
    %30 = arith.addf %24, %29 : vector<128x128xf32>
    %c1_46 = arith.constant 1 : index
    %c0_47 = arith.constant 0 : index
    %c0_48 = arith.constant 0 : index
    %31 = vector.load %arg8[%c1_46, %c0_47, %c0_48] : memref<10x18x64xbf16, #tpu.memory_space<vmem>>, vector<8x16x64xbf16>
    %32 = vector.shape_cast %31 : vector<8x16x64xbf16> to vector<128x64xbf16>
    %c3 = arith.constant 3 : index
    %c0_49 = arith.constant 0 : index
    %c0_50 = arith.constant 0 : index
    %33 = vector.load %arg5[%c3, %c0_49, %c0_50] : memref<9x64x128xbf16, #tpu.memory_space<vmem>>, vector<1x64x128xbf16>
    %34 = vector.shape_cast %33 : vector<1x64x128xbf16> to vector<64x128xbf16>
    %cst_51 = arith.constant dense<0.000000e+00> : vector<128x128xf32>
    %35 = tpu.matmul %32, %34, %cst_51 {dimension_numbers = #tpu.dot_dimension_numbers<[1], [0], [0], [1], [0, 0, 1, 1], [], []>} : vector<128x64xbf16>, vector<64x128xbf16>, vector<128x128xf32> -> vector<128x128xf32>
    %36 = arith.addf %30, %35 : vector<128x128xf32>
    %c1_52 = arith.constant 1 : index
    %c1_53 = arith.constant 1 : index
    %c0_54 = arith.constant 0 : index
    %37 = vector.load %arg8[%c1_52, %c1_53, %c0_54] : memref<10x18x64xbf16, #tpu.memory_space<vmem>>, vector<8x16x64xbf16>
    %38 = vector.shape_cast %37 : vector<8x16x64xbf16> to vector<128x64xbf16>
    %c4 = arith.constant 4 : index
    %c0_55 = arith.constant 0 : index
    %c0_56 = arith.constant 0 : index
    %39 = vector.load %arg5[%c4, %c0_55, %c0_56] : memref<9x64x128xbf16, #tpu.memory_space<vmem>>, vector<1x64x128xbf16>
    %40 = vector.shape_cast %39 : vector<1x64x128xbf16> to vector<64x128xbf16>
    %cst_57 = arith.constant dense<0.000000e+00> : vector<128x128xf32>
    %41 = tpu.matmul %38, %40, %cst_57 {dimension_numbers = #tpu.dot_dimension_numbers<[1], [0], [0], [1], [0, 0, 1, 1], [], []>} : vector<128x64xbf16>, vector<64x128xbf16>, vector<128x128xf32> -> vector<128x128xf32>
    %42 = arith.addf %36, %41 : vector<128x128xf32>
    %c1_58 = arith.constant 1 : index
    %c2_59 = arith.constant 2 : index
    %c0_60 = arith.constant 0 : index
    %43 = vector.load %arg8[%c1_58, %c2_59, %c0_60] : memref<10x18x64xbf16, #tpu.memory_space<vmem>>, vector<8x16x64xbf16>
    %44 = vector.shape_cast %43 : vector<8x16x64xbf16> to vector<128x64xbf16>
    %c5 = arith.constant 5 : index
    %c0_61 = arith.constant 0 : index
    %c0_62 = arith.constant 0 : index
    %45 = vector.load %arg5[%c5, %c0_61, %c0_62] : memref<9x64x128xbf16, #tpu.memory_space<vmem>>, vector<1x64x128xbf16>
    %46 = vector.shape_cast %45 : vector<1x64x128xbf16> to vector<64x128xbf16>
    %cst_63 = arith.constant dense<0.000000e+00> : vector<128x128xf32>
    %47 = tpu.matmul %44, %46, %cst_63 {dimension_numbers = #tpu.dot_dimension_numbers<[1], [0], [0], [1], [0, 0, 1, 1], [], []>} : vector<128x64xbf16>, vector<64x128xbf16>, vector<128x128xf32> -> vector<128x128xf32>
    %48 = arith.addf %42, %47 : vector<128x128xf32>
    %c2_64 = arith.constant 2 : index
    %c0_65 = arith.constant 0 : index
    %c0_66 = arith.constant 0 : index
    %49 = vector.load %arg8[%c2_64, %c0_65, %c0_66] : memref<10x18x64xbf16, #tpu.memory_space<vmem>>, vector<8x16x64xbf16>
    %50 = vector.shape_cast %49 : vector<8x16x64xbf16> to vector<128x64xbf16>
    %c6 = arith.constant 6 : index
    %c0_67 = arith.constant 0 : index
    %c0_68 = arith.constant 0 : index
    %51 = vector.load %arg5[%c6, %c0_67, %c0_68] : memref<9x64x128xbf16, #tpu.memory_space<vmem>>, vector<1x64x128xbf16>
    %52 = vector.shape_cast %51 : vector<1x64x128xbf16> to vector<64x128xbf16>
    %cst_69 = arith.constant dense<0.000000e+00> : vector<128x128xf32>
    %53 = tpu.matmul %50, %52, %cst_69 {dimension_numbers = #tpu.dot_dimension_numbers<[1], [0], [0], [1], [0, 0, 1, 1], [], []>} : vector<128x64xbf16>, vector<64x128xbf16>, vector<128x128xf32> -> vector<128x128xf32>
    %54 = arith.addf %48, %53 : vector<128x128xf32>
    %c2_70 = arith.constant 2 : index
    %c1_71 = arith.constant 1 : index
    %c0_72 = arith.constant 0 : index
    %55 = vector.load %arg8[%c2_70, %c1_71, %c0_72] : memref<10x18x64xbf16, #tpu.memory_space<vmem>>, vector<8x16x64xbf16>
    %56 = vector.shape_cast %55 : vector<8x16x64xbf16> to vector<128x64xbf16>
    %c7 = arith.constant 7 : index
    %c0_73 = arith.constant 0 : index
    %c0_74 = arith.constant 0 : index
    %57 = vector.load %arg5[%c7, %c0_73, %c0_74] : memref<9x64x128xbf16, #tpu.memory_space<vmem>>, vector<1x64x128xbf16>
    %58 = vector.shape_cast %57 : vector<1x64x128xbf16> to vector<64x128xbf16>
    %cst_75 = arith.constant dense<0.000000e+00> : vector<128x128xf32>
    %59 = tpu.matmul %56, %58, %cst_75 {dimension_numbers = #tpu.dot_dimension_numbers<[1], [0], [0], [1], [0, 0, 1, 1], [], []>} : vector<128x64xbf16>, vector<64x128xbf16>, vector<128x128xf32> -> vector<128x128xf32>
    %60 = arith.addf %54, %59 : vector<128x128xf32>
    %c2_76 = arith.constant 2 : index
    %c2_77 = arith.constant 2 : index
    %c0_78 = arith.constant 0 : index
    %61 = vector.load %arg8[%c2_76, %c2_77, %c0_78] : memref<10x18x64xbf16, #tpu.memory_space<vmem>>, vector<8x16x64xbf16>
    %62 = vector.shape_cast %61 : vector<8x16x64xbf16> to vector<128x64xbf16>
    %c8 = arith.constant 8 : index
    %c0_79 = arith.constant 0 : index
    %c0_80 = arith.constant 0 : index
    %63 = vector.load %arg5[%c8, %c0_79, %c0_80] : memref<9x64x128xbf16, #tpu.memory_space<vmem>>, vector<1x64x128xbf16>
    %64 = vector.shape_cast %63 : vector<1x64x128xbf16> to vector<64x128xbf16>
    %cst_81 = arith.constant dense<0.000000e+00> : vector<128x128xf32>
    %65 = tpu.matmul %62, %64, %cst_81 {dimension_numbers = #tpu.dot_dimension_numbers<[1], [0], [0], [1], [0, 0, 1, 1], [], []>} : vector<128x64xbf16>, vector<64x128xbf16>, vector<128x128xf32> -> vector<128x128xf32>
    %66 = arith.addf %60, %65 : vector<128x128xf32>
    %c0_82 = arith.constant 0 : index
    %c0_83 = arith.constant 0 : index
    %67 = vector.load %arg6[%c0_82, %c0_83] : memref<1x128xf32, #tpu.memory_space<vmem>>, vector<1x128xf32>
    %68 = vector.broadcast %67 : vector<1x128xf32> to vector<128x128xf32>
    %69 = arith.addf %66, %68 : vector<128x128xf32>
    %cst_84 = arith.constant 0.000000e+00 : f32
    %70 = vector.broadcast %cst_84 : f32 to vector<128x128xf32>
    %71 = arith.maximumf %69, %70 : vector<128x128xf32>
    %72 = arith.truncf %71 : vector<128x128xf32> to vector<128x128xbf16>
    %c0_85 = arith.constant 0 : index
    %c0_86 = arith.constant 0 : index
    %c0_87 = arith.constant 0 : index
    %73 = vector.load %arg7[%c0_85, %c0_86, %c0_87] : memref<1x128x128xbf16, #tpu.memory_space<vmem>>, vector<1x128x128xbf16>
    %74 = vector.shape_cast %73 : vector<1x128x128xbf16> to vector<128x128xbf16>
    %75 = vector.shape_cast %72 : vector<128x128xbf16> to vector<1x128x128xbf16>
    tpu.vector_store %arg7[%c0_85, %c0_86, %c0_87], %75 {strides = array<i32>} : memref<1x128x128xbf16, #tpu.memory_space<vmem>>, vector<1x128x128xbf16>,
    return
  }
  func.func @transform_0(%arg0: i32, %arg1: i32, %arg2: i32) -> (i32, i32, i32, i32) {
    %c0_i32 = arith.constant 0 : i32
    %c0_i32_0 = arith.constant 0 : i32
    %c0_i32_1 = arith.constant 0 : i32
    return %arg0, %arg2, %c0_i32, %c0_i32_0 : i32, i32, i32, i32
  }
  func.func @transform_1(%arg0: i32, %arg1: i32, %arg2: i32) -> (i32, i32, i32, i32, i32) {
    %c0_i32 = arith.constant 0 : i32
    %c0_i32_0 = arith.constant 0 : i32
    %c0_i32_1 = arith.constant 0 : i32
    %c0_i32_2 = arith.constant 0 : i32
    return %arg0, %arg2, %c0_i32, %c0_i32_0, %c0_i32_1 : i32, i32, i32, i32, i32
  }
  func.func @transform_2(%arg0: i32, %arg1: i32, %arg2: i32) -> (i32, i32, i32) {
    %c0_i32 = arith.constant 0 : i32
    %c0_i32_0 = arith.constant 0 : i32
    %c0_i32_1 = arith.constant 0 : i32
    return %c0_i32, %c0_i32_0, %arg1 : i32, i32, i32
  }
  func.func @transform_3(%arg0: i32, %arg1: i32, %arg2: i32) -> (i32, i32) {
    %c0_i32 = arith.constant 0 : i32
    %c0_i32_0 = arith.constant 0 : i32
    return %c0_i32, %arg1 : i32, i32
  }
  func.func @transform_4(%arg0: i32, %arg1: i32, %arg2: i32) -> (i32, i32, i32) {
    %c0_i32 = arith.constant 0 : i32
    return %arg0, %arg2, %arg1 : i32, i32, i32
  }
}

</mosaic_0001>

<bundles_post_ra>
// kernel: tpu_custom_call.1
= control target key start
LH: loop header
LB: loop body
LE: loop exit
PB: predicated region body
PF: predicated region fallthrough
CT: control target
= control target key end

     0   :  { %s5986_s0 = inlined_call_operand.hbm [shape: bf16[1,16,16,64], index: 0, kind: input, shape index: {}]   ;;  %s5987_s1 = inlined_call_operand.hbm [shape: bf16[1,2,2,16,64], index: 1, kind: input, shape index: {}]   ;;  %s5988_s2 = inlined_call_operand.hbm [shape: bf16[9,64,128], index: 2, kind: input, shape index: {}]   ;;  %s5989_s3 = inlined_call_operand.vmem [shape: f32[1,128], index: 3, kind: input, shape index: {}]   ;;  %s5990_s4 = inlined_call_operand.hbm [shape: bf16[1,256,128], index: 4, kind: output, shape index: {}]  }
   0x1   :  { %5999 = sst [smem:[#allocation16_spill]] %s5986_s0 }
   0x2   :  { %6000 = sst [smem:[#allocation17_spill]] %s5988_s2 }
   0x3   :  { %9 = vsyncpa [#allocation4], 0 }
   0x4   :  { %11 = vsyncpa [#allocation4 + $0x1], 0 }
   0x5   :  { %12 = vsyncpa [#allocation7], 0 }
   0x6   :  { %14 = vsyncpa [#allocation7 + $0x1], 0 }
   0x7   :  { %15 = vsyncpa [#allocation5], 0 }
   0x8   :  { %17 = vsyncpa [#allocation5 + $0x1], 0  ;;  %s4804_s15 = smov 0   ;;  %s4806_s16 = smov 0  }
   0x9   :  { %s4808_s17 = smov 0   ;;  %s4810_s18 = smov 0  }
   0xa   :  { %s4812_s19 = smov 0   ;;  %s4814_s20 = smov 0  }
   0xb LB: > { %s4835_s21 = sadd.s32 4294967295, %s4769_s20   ;;  %s3671_s22 = sadd.s32 4294967294, %s4769_s20   ;;  %s4769_s20 = sphi %s4814_s20, %s23_s20   ;;  %s4765_s19 = sphi %s4812_s19, %s6046_s19   ;;  %s4761_s18 = sphi %s4810_s18, %s6045_s18   ;;  %s4757_s17 = sphi %s4808_s17, %s6044_s17   ;;  %s4753_s16 = sphi %s4806_s16, %s6043_s16   ;;  %s4749_s15 = sphi %s4804_s15, %s6042_s15  }
   0xc   : > { %p64_p0 = scmp.ne.s32.totalorder %s4753_s16, %s4749_s15  ;;  %p5991_p1 = scmp.eq.s32.totalorder %s4835_s21, 0 }
   0xd   : > { %p178_p3 = scmp.eq.s32.totalorder %s3671_s22, 1  ;;  %p3672_p5 = scmp.ge.s32.totalorder %s4769_s20, 1 }
   0xe   : > { %p4844_p4 = por %p5991_p1, %p64_p0  ;;  %p185_p7 = scmp.lt.s32.totalorder %s4769_s20, 3 }
   0xf   : > { %p4849_p6 = por %p178_p3, %p64_p0  ;;  %s4771_s26 = smov [#allocation8]  }
  0x10   : > { %s6001_s23 = scalar_select %p4844_p4, 1, 0 }
  0x11   : > { %s6002_s24 = scalar_select %p4849_p6, 1, 0 }
  0x12   : > { %p4854_p8 = pnand %p3672_p5, %p185_p7  ;;  %s199_s27 = sshll.u32 %s4771_s26, 4  ;;  %s200_s27 = int_to_ptr.vmem [resolvable:$true] %s199_s27 }
  0x13   : > { %s35_s29 = sadd.s32 1, %s4765_s19  ;;  %s6005_s2 = sld [smem:[#allocation17_spill]] }
  0x14   : > { %s6003_s25 = scalar_select %p4854_p8, 1, 0 }
  0x15   : > { %p4453_p9 = pneg %p4854_p8 }
  0x17   : > { %p4863_p11 = pnand %p4453_p9, %p5991_p1 }
  0x19   : > { %s4591_s6 = scalar_lea.hbm %s6005_s2, 4608  ;;  %p4593_p13 = pneg %p4863_p11 }
  0x1a   : > { %p4592_p12 = scmp.ne.s32.totalorder %s6005_s2, %s4591_s6  ;;  %p4598_p5 = scmp.lt.u32.totalorder %s4591_s6, %s6005_s2 }
  0x1c   : > { %p4594_p0 = pnand %p4593_p13, %p4592_p12 }
  0x1e   : > { %p4595_p3 = pneg %p4594_p0 }
  0x20   : > { %p4600_p7 = pnand %p4598_p5, %p4595_p3 }
  0x22   : > { %4603 = shalt.err (!%p4600_p7)
}
  0x23   : > { %s4604_s11 = scalar_lea.vmem %s200_s27, 4608  ;;  %p4612_p2 = scmp.lt.s32.totalorder %s200_s27, %s200_s27 }
  0x24   : > { %p4605_p9 = scmp.ne.s32.totalorder %s200_s27, %s4604_s11  ;;  %p4613_p6 = scmp.lt.s32.totalorder %s4604_s11, %s4604_s11 }
  0x26   : > { %p4607_p10 = pnand %p4605_p9, %p4593_p13  ;;  %p4614_p4 = por %p4613_p6, %p4612_p2 }
  0x28   : > { %p4608_p1 = pneg %p4607_p10 }
  0x2a   : > { %p4615_p8 = pnand %p4614_p4, %p4608_p1 }
  0x2c   : > { %4618 = shalt.err (!%p4615_p8)
}
  0x2d   : > { %s5994_s12 = smov 64   ;;  %s5996_s13 = smov 4  }
  0x2e   : > { %4456 = dma.hbm_to_vmem [thread:$0]  (!%p4863_p11), %s6005_s2, 4608, %s200_s27, [#allocation7], %s5994_s12, %s5994_s12, %s5996_s13  }
  0x2f   : > { %p36_p1 = scmp.ge.s32.totalorder %s35_s29, 2  ;;  %s51_s26 = sadd.s32 1, %s4757_s17 }
  0x30   : > { %p58_p2 = scmp.ne.s32.totalorder %s4757_s17, %s4753_s16  ;;  %p59_p4 = scmp.eq.s32.totalorder %s4769_s20, 0 }
  0x31   : > { %s6048_s29 = smov (%p36_p1, %s35_s29), 0  ;;  %p6008_p8 = scmp.eq.s32.totalorder %s4835_s21, 1 }
  0x32   : > { %6006 = sst [smem:[#allocation14_spill]] %s6048_s29  ;;  %p4893_p6 = por %p59_p4, %p58_p2 }
  0x33   : > { %p4899_p10 = por %p6008_p8, %p58_p2  ;;  %s47_s5 = ssub.s32 %s4765_s19, %s6048_s29 }
  0x34   : > { %p4469_p11 = scmp.lt.s32.totalorder %s4769_s20, 2  ;;  %p49_p12 = scmp.eq.s32.totalorder %s47_s5, 0 }
  0x35   : > { %s4907_s27 = sand.u32 1, %s4757_s17   ;;  %s3917_s8 = sshll.u32 %s4765_s19, 10 }
  0x36   : > { %s3676_s6 = sshll.u32 %s4907_s27, 6  ;;  %s6011_s0 = sld [smem:[#allocation16_spill]] }
  0x37   : > { %s4911_s7 = scalar_select %p49_p12, %s4757_s17, %s51_s26  }
  0x38   : > { %s223_s14 = scalar_lea.vmem [#allocation3], %s3676_s6  ;;  %p4923_p13 = pnand %p4469_p11, %p4893_p6 }
  0x39   : > { %6010 = sst [smem:[#allocation15_spill]] %s4911_s7  ;;  %s233_s22 = sshll.u32 %s223_s14, 4  ;;  %s4919_s22 = int_to_ptr.vmem [resolvable:$true] %s233_s22 }
  0x3a   : > { %s3680_s12 = sshll.u32 %s4907_s27, 4  ;;  %s220_s9 = scalar_lea.sflag [#allocation4], %s4907_s27 }
  0x3b   : > { %p4621_p3 = pneg %p4923_p13 }
  0x3c   : > { %s4917_s11 = scalar_lea.hbm %s6011_s0, %s3917_s8  ;;  %s4624_s30 = scalar_lea.hbm %s6011_s0, 2048 }
  0x3d   : > { %s4619_s8 = scalar_lea.hbm %s4917_s11, 1024  ;;  %p4625_p9 = scmp.lt.u32.totalorder %s4917_s11, %s6011_s0 }
  0x3e   : > { %p4620_p0 = scmp.ne.s32.totalorder %s4917_s11, %s4619_s8  ;;  %p4626_p1 = scmp.lt.u32.totalorder %s4624_s30, %s4619_s8 }
  0x3f   : > { %p4628_p4 = scmp.lt.u32.totalorder %s4619_s8, %s4917_s11 }
  0x40   : > { %p4622_p5 = pnand %p4621_p3, %p4620_p0  ;;  %p4627_p2 = por %p4626_p1, %p4625_p9 }
  0x42   : > { %p4623_p7 = pneg %p4622_p5  ;;  %p4629_p6 = por %p4628_p4, %p4627_p2 }
  0x44   : > { %p4630_p8 = pnand %p4629_p6, %p4623_p7 }
  0x46   : > { %4633 = shalt.err (!%p4630_p8)
}
  0x47   : > { %s4634_s26 = scalar_lea.vmem %s4919_s22, 1024  ;;  %s4774_s6 = smov [#allocation3]  }
  0x48   : > { %p4635_p11 = scmp.ne.s32.totalorder %s4919_s22, %s4634_s26  ;;  %s4639_s10 = sshll.u32 %s4774_s6, 4  ;;  %s4640_s10 = int_to_ptr.vmem [resolvable:$false] %s4639_s10 }
  0x49   : > { %s4641_s13 = scalar_lea.vmem %s4640_s10, 2048  ;;  %p4642_p5 = scmp.lt.s32.totalorder %s4919_s22, %s4640_s10 }
  0x4a   : > { %p4637_p12 = pnand %p4635_p11, %p4621_p3  ;;  %p4643_p9 = scmp.lt.s32.totalorder %s4641_s13, %s4634_s26 }
  0x4c   : > { %p4638_p0 = pneg %p4637_p12  ;;  %p4644_p1 = por %p4643_p9, %p4642_p5 }
  0x4e   : > { %p4645_p2 = pnand %p4644_p1, %p4638_p0 }
  0x50   : > { %4648 = shalt.err (!%p4645_p2)
}
  0x51   : > { %s6013_s8 = smov 4   ;;  %s6014_s30 = smov 64  }
  0x52   : > { %4460 = dma.hbm_to_vmem [thread:$0]  (!%p4923_p13), %s4917_s11, 1024, %s4919_s22, %s220_s9, %s6014_s30, %s6014_s30, %s6013_s8  }
  0x53   : > { %s3918_s14 = sshll.u32 %s4765_s19, 8  ;;  %s247_s13 = scalar_lea.vmem [#allocation6], %s3680_s12 }
  0x54   : > { %s4964_s10 = scalar_lea.hbm %s5987_s1, %s3918_s14  ;;  %s256_s0 = sshll.u32 %s247_s13, 4  ;;  %s4968_s0 = int_to_ptr.vmem [resolvable:$true] %s256_s0 }
  0x55   : > { %s6015_s2 = sand.u32 1, %s4769_s20   ;;  %s4649_s7 = scalar_lea.hbm %s4964_s10, 256 }
  0x56   : > { %s4972_s29 = scalar_lea.sflag [#allocation7], %s6015_s2  ;;  %p4650_p7 = scmp.ne.s32.totalorder %s4964_s10, %s4649_s7 }
  0x57   : > { %s4654_s27 = scalar_lea.hbm %s5987_s1, 512  ;;  %p4655_p8 = scmp.lt.u32.totalorder %s4964_s10, %s5987_s1 }
  0x58   : > { %p4652_p4 = pnand %p4650_p7, %p4621_p3  ;;  %p4656_p11 = scmp.lt.u32.totalorder %s4654_s27, %s4649_s7 }
  0x59   : > { %p4658_p0 = scmp.lt.u32.totalorder %s4649_s7, %s4964_s10 }
  0x5a   : > { %p4653_p6 = pneg %p4652_p4  ;;  %p4657_p12 = por %p4656_p11, %p4655_p8 }
  0x5c   : > { %p4659_p5 = por %p4658_p0, %p4657_p12 }
  0x5e   : > { %p4660_p9 = pnand %p4659_p5, %p4653_p6 }
  0x60   : > { %4663 = shalt.err (!%p4660_p9)
}
  0x61   : > { %s4664_s2 = scalar_lea.vmem %s4968_s0, 256  ;;  %s4775_s12 = smov [#allocation6]  }
  0x62   : > { %p4665_p1 = scmp.ne.s32.totalorder %s4968_s0, %s4664_s2  ;;  %s4669_s6 = sshll.u32 %s4775_s12, 4  ;;  %s4670_s6 = int_to_ptr.vmem [resolvable:$false] %s4669_s6 }
  0x63   : > { %s4671_s26 = scalar_lea.vmem %s4670_s6, 512  ;;  %p4672_p4 = scmp.lt.s32.totalorder %s4968_s0, %s4670_s6 }
  0x64   : > { %p4667_p2 = pnand %p4665_p1, %p4621_p3  ;;  %p4673_p8 = scmp.lt.s32.totalorder %s4671_s26, %s4664_s2 }
  0x66   : > { %p4668_p7 = pneg %p4667_p2  ;;  %p4674_p11 = por %p4673_p8, %p4672_p4 }
  0x68   : > { %p4675_p12 = pnand %p4674_p11, %p4668_p7 }
  0x6a   : > { %4678 = shalt.err (!%p4675_p12)
}
  0x6b   : > { %4463 = dma.hbm_to_vmem [thread:$0]  (!%p4923_p13), %s4964_s10, 256, %s4968_s0, %s4972_s29, %s6014_s30, %s6014_s30, %s6013_s8  }
  0x6c   : > { %p6016_p3 = scmp.ne.s32.totalorder %s6003_s25, 0 }
  0x6d   : > { %s5004_s7 = sand.u32 (!%p6016_p3), 1, %s4753_s16   ;;  %p6017_p6 = scmp.ne.s32.totalorder (!%p6016_p3), %s6001_s23, 0 }
  0x6e   : > { %268 = sbr.rel (%p6016_p3) target bundleno = 590 (0x24e), region = 36  ;;  %s3684_s13 = sshll.u32 (!%p6016_p3), %s5004_s7, 6 }
  0x6f   : > { %s271_s11 = scalar_lea.sflag (!%p6016_p3), [#allocation4], %s5004_s7  ;;  %s5010_s5 = scalar_lea.vmem (!%p6016_p3), [#allocation3], %s3684_s13 }
  0x75   : > { %4732 = dma.done.wait (%p6017_p6), %s271_s11, 1024  }
  0x76   : > { %4734 = vsyncadd (%p6017_p6), %s271_s11, 4294966272  ;;  %s279_s0 = sand.u32 1, %s4835_s21   ;;  %s3685_s25 = sshll.u32 %s5004_s7, 4 }
  0x77   : > { %s280_s29 = scalar_lea.sflag [#allocation7], %s279_s0  ;;  %s5018_s8 = scalar_lea.vmem [#allocation6], %s3685_s25 }
  0x78   : > { %4736 = dma.done.wait (%p6017_p6), %s280_s29, 256  }
  0x79   : > { %4738 = vsyncadd (%p6017_p6), %s280_s29, 4294967040  ;;  %p6018_p13 = scmp.eq.s32.totalorder %s4835_s21, 0 }
  0x7b   : > { %4740 = dma.done.wait (%p6018_p13), [#allocation7], 4608   ;;  %p6019_p0 = pmov %p6018_p13 }
  0x7c   : > { %vm326_vm0 = vcmask 516096   ;;  %vm327_vm1 = vsmask.f32 256  ;;  %vm359_vm2 = vsmask.f32 7938  ;;  %v4525_v2 = vld [vmem:[#allocation8 + $0x20] sm:$0xff]  }
  0x7d   : > { %4742 = vsyncadd (%p6019_p0), [#allocation7], 4294962688  ;;  %v4526_v3 = vld [vmem:[#allocation8 + $0x80] sm:$0xff]   ;;  %4091 = vmatprep.subr.bf16.mxu1 %v4525_v2  ;;  %v4527_v4 = vld [vmem:[#allocation8 + $0x28] sm:$0xff]   ;;  %vm393_vm5 = vsmask.f32 4368 }
  0x7e   : > { %vm5029_vm3 = vmand %vm326_vm0, %vm327_vm1  ;;  %4187 = vmatprep.subr.bf16.mxu0 %v4526_v3  ;;  %4092 = vmatpush3.bf16.msra.mxu1 %v4525_v2  ;;  %v4528_v5 = vld [vmem:[#allocation8 + $0x88] sm:$0xff]   ;;  %v4529_v6 = vld [vmem:[#allocation8 + $0x30] sm:$0xff]   ;;  %vm415_vm6 = vcmask 519168   ;;  %vm721_vm9 = vsmask.f32 3328  ;;  %vm973_vm11 = vcmask 523264  }
  0x7f   : > { %vm5034_vm4 = vmand %vm326_vm0, %vm359_vm2  ;;  %4188 = vmatpush3.bf16.msra.mxu0 %v4526_v3  ;;  %4093 = vmatprep.subr.bf16.mxu1 %v4527_v4  ;;  %v4530_v7 = vld [vmem:[#allocation8 + $0x90] sm:$0xff]   ;;  %v4531_v8 = vld [vmem:[#allocation8 + $0x38] sm:$0xff]   ;;  %vm722_vm10 = vsmask.f32 7440  ;;  %vm1304_vm13 = vcmask 1042432   ;;  %vm1305_vm14 = vcmask 1046532  }
  0x80   : > { %4189 = vmatprep.subr.bf16.mxu0 %v4528_v5  ;;  %v4532_v9 = vld [vmem:[#allocation8 + $0x98] sm:$0xff]   ;;  %v329_v10 = vld [vmem:[#allocation2] sm:$0x1]  ;;  %v361_v11 = vld [vmem:[#allocation2 + $0x8] sm:$0x1]  ;;  %s5908_s30 = scalar_lea.vmem [#allocation9], %s3684_s13 }
  0x81   : > { %v391_v12 = vld [vmem:[%s5018_s8] sm:$0xf]  ;;  %v330_v13 = vsel %vm5029_vm3, 0, %v329_v10  ;;  %v362_v14 = vsel %vm5034_vm4, 0, %v361_v11  ;;  %v392_v15 = vld [vmem:[%s5018_s8 + $0x4] sm:$0xf]  ;;  %vm5053_vm7 = vmor %vm327_vm1, %vm393_vm5 }
  0x82   : > { %4094 = vmatpush3.bf16.msra.mxu1 %v4527_v4  ;;  %v396_v16 = vshrl.u32 %v391_v12, 16  ;;  %v399_v17 = vshll.u32 %v391_v12, 16  ;;  %331 = vst [vmem:[#allocation2] sm:$0x1] %v330_v13  ;;  %363 = vst [vmem:[#allocation2 + $0x8] sm:$0x1] %v362_v14 }
  0x83   : > { %4190 = vmatpush3.bf16.msra.mxu0 %v4528_v5  ;;  %4095 = vmatprep.subr.bf16.mxu1 %v4529_v6  ;;  %v404_v18 = vshrl.u32 %v392_v15, 16  ;;  %v407_v19 = vshll.u32 %v392_v15, 16  ;;  %v332_v21 = vld [vmem:[#allocation2 + $0xc] sm:$0x1]  ;;  %v364_v22 = vld [vmem:[#allocation2 + $0x14] sm:$0x1]  ;;  %vm5062_vm8 = vmand %vm415_vm6, %vm359_vm2 }
  0x84   : > { %4191 = vmatprep.subr.bf16.mxu0 %v4530_v7  ;;  %v398_v20 = vrot.slane %v396_v16, 7  ;;  %v5044_v24 = vld [vmem:[#allocation8] sm:$0xff]   ;;  %v333_v25 = vsel %vm5029_vm3, 0, %v332_v21  ;;  %v365_v26 = vsel %vm5034_vm4, 0, %v364_v22  ;;  %v367_v45 = vld [vmem:[#allocation2 + $0x20] sm:$0x1]  ;;  %vm5109_vm12 = vmor %vm721_vm9, %vm722_vm10 }
  0x85   : > { %v406_v23 = vrot.slane %v404_v18, 7  ;;  %v425_v27 = vld [vmem:[%s5010_s5] sm:$0xf]  ;;  %334 = vst [vmem:[#allocation2 + $0xc] sm:$0x1] %v333_v25  ;;  %v368_v51 = vsel %vm5034_vm4, 0, %v367_v45  ;;  %vm5183_vm15 = vmor %vm1304_vm13, %vm1305_vm14 }
  0x86   : > { %4096 = vmatpush3.bf16.msra.mxu1 %v4529_v6  ;;  %v401_v29 = vor.u32 %v399_v17, %v398_v20  ;;  %v402_v30 = vrot.slane %v398_v20, 4  ;;  %366 = vst [vmem:[#allocation2 + $0x14] sm:$0x1] %v365_v26  ;;  %v426_v31 = vld [vmem:[%s5010_s5 + $0x4] sm:$0xf]  ;;  %v442_v32 = vshrl.u32 %v425_v27, 16 }
  0x87   : > { %4192 = vmatpush3.bf16.msra.mxu0 %v4530_v7  ;;  %4097 = vmatprep.subr.bf16.mxu1 %v4531_v8  ;;  %v445_v33 = vshll.u32 %v425_v27, 16  ;;  %v5058_v34 = vld [vmem:[#allocation8 + $0xa0] sm:$0xff]   ;;  %v409_v35 = vor.u32 %v407_v19, %v406_v23  ;;  %v411_v36 = vrot.slane %v406_v23, 4  ;;  %v450_v37 = vshrl.u32 %v426_v31, 16  ;;  %v427_v46 = vld [vmem:[%s5010_s5 + $0x8] sm:$0xf] }
  0x88   : > { %4193 = vmatprep.subr.bf16.mxu0 %v4532_v9  ;;  %v453_v38 = vshll.u32 %v426_v31, 16  ;;  %v444_v40 = vrot.slane %v442_v32, 7  ;;  %v335_v41 = vld [vmem:[#allocation2 + $0x18] sm:$0x1]  ;;  %369 = vst [vmem:[#allocation2 + $0x20] sm:$0x1] %v368_v51 }
  0x89   : > { %v410_v42 = vsel %vm5053_vm7, %v402_v30, %v409_v35  ;;  %v452_v43 = vrot.slane %v450_v37, 7  ;;  %v336_v44 = vsel %vm5029_vm3, 0, %v335_v41  ;;  %v417_v47 = vld [vmem:[#allocation2] sm:$0xf]  ;;  %v422_v48 = vld [vmem:[#allocation2 + $0x8] sm:$0x1] }
  0x8a   : > { %4098 = vmatpush3.bf16.msra.mxu1 %v4531_v8  ;;  %421 = vst.msk [vmem:[#allocation2 + $0x4] sm:$0xf] %vm415_vm6, %v410_v42  ;;  %v447_v49 = vor.u32 %v445_v33, %v444_v40  ;;  %v448_v50 = vrot.slane %v444_v40, 4  ;;  %337 = vst [vmem:[#allocation2 + $0x18] sm:$0x1] %v336_v44  ;;  %v418_v52 = vsel %vm5062_vm8, %v401_v29, %v417_v47  ;;  %v459_v57 = vshrl.u32 %v427_v46, 16 }
  0x8b   : > { %4194 = vmatpush3.bf16.msra.mxu0 %v4532_v9  ;;  %4115 = vmatprep.subr.bf16.mxu1 %v5044_v24  ;;  %v423_v53 = vsel %vm5029_vm3, %v411_v36, %v422_v48  ;;  %v455_v54 = vor.u32 %v453_v38, %v452_v43  ;;  %v457_v55 = vrot.slane %v452_v43, 4  ;;  %v428_v56 = vld [vmem:[%s5010_s5 + $0xc] sm:$0xf]  ;;  %419 = vst [vmem:[#allocation2] sm:$0xf] %v418_v52  ;;  %v462_v58 = vshll.u32 %v427_v46, 16 }
  0x8c   : > { %4211 = vmatprep.subr.bf16.mxu0 %v5058_v34  ;;  %424 = vst [vmem:[#allocation2 + $0x8] sm:$0x1] %v423_v53  ;;  %v467_v59 = vshrl.u32 %v428_v56, 16  ;;  %v470_v60 = vshll.u32 %v428_v56, 16  ;;  %v602_v62 = vld [vmem:[#allocation2 + $0xc] sm:$0xf] }
  0x8d   : > { %v456_v61 = vsel %vm5053_vm7, %v448_v50, %v455_v54  ;;  %v606_v63 = vld [vmem:[#allocation2 + $0x14] sm:$0x1]  ;;  %v603_v2 = vsel %vm5062_vm8, %v447_v49, %v602_v62  ;;  %v461_v4 = vrot.slane %v459_v57, 7  ;;  %v338_v6 = vld [vmem:[#allocation2 + $0x24] sm:$0x1]  ;;  %s3935_s10 = sshll.u32 %s4761_s18, 10 }
  0x8e   : > { %605 = vst.msk [vmem:[#allocation2 + $0x10] sm:$0xf] %vm415_vm6, %v456_v61  ;;  %v607_v3 = vsel %vm5029_vm3, %v457_v55, %v606_v63  ;;  %v469_v5 = vrot.slane %v467_v59, 7  ;;  %604 = vst [vmem:[#allocation2 + $0xc] sm:$0xf] %v603_v2  ;;  %v339_v7 = vsel %vm5029_vm3, 0, %v338_v6  ;;  %s5933_s14 = scalar_lea.hbm %s5990_s4, %s3935_s10 }
  0x8f   : > { %608 = vst [vmem:[#allocation2 + $0x14] sm:$0x1] %v607_v3  ;;  %v370_v8 = vld [vmem:[#allocation2 + $0x2c] sm:$0x1]  ;;  %v464_v9 = vor.u32 %v462_v58, %v461_v4  ;;  %v465_v10 = vrot.slane %v461_v4, 4  ;;  %s3530_s22 = sshll.u32 %s5908_s30, 4  ;;  %s5935_s22 = int_to_ptr.vmem [resolvable:$true] %s3530_s22 }
  0x90   : > { %v472_v11 = vor.u32 %v470_v60, %v469_v5  ;;  %v474_v12 = vrot.slane %v469_v5, 4  ;;  %340 = vst [vmem:[#allocation2 + $0x24] sm:$0x1] %v339_v7  ;;  %v5091_v13 = vld [vmem:[%s5010_s5 + $0x10] sm:$0xf]  ;;  %v371_v16 = vsel %vm5034_vm4, 0, %v370_v8 }
  0x91   : > { %v690_v14 = vld [vmem:[#allocation2 + $0x4] sm:$0xf]  ;;  %v609_v15 = vld [vmem:[#allocation2 + $0x18] sm:$0xf]  ;;  %v613_v21 = vld [vmem:[#allocation2 + $0x20] sm:$0x1] }
  0x92   : > { %v734_v17 = vshll.u32 %v690_v14, 16  ;;  %v738_v18 = vshrl.u32 %v690_v14, 16  ;;  %v473_v19 = vsel %vm5053_vm7, %v465_v10, %v472_v11  ;;  %v610_v20 = vsel %vm5062_vm8, %v464_v9, %v609_v15  ;;  %372 = vst [vmem:[#allocation2 + $0x2c] sm:$0x1] %v371_v16  ;;  %v689_v22 = vld [vmem:[#allocation2] sm:$0xf] }
  0x93   : > { %v713_v23 = vld [vmem:[#allocation2 + $0x8] sm:$0x1]  ;;  %611 = vst [vmem:[#allocation2 + $0x18] sm:$0xf] %v610_v20  ;;  %612 = vst.msk [vmem:[#allocation2 + $0x1c] sm:$0xf] %vm415_vm6, %v473_v19  ;;  %v614_v25 = vsel %vm5029_vm3, %v474_v12, %v613_v21 }
  0x94   : > { %v725_v26 = vshrl.u32 %v689_v22, 16  ;;  %v728_v27 = vshll.u32 %v689_v22, 16  ;;  %v736_v29 = vrot.slane %v734_v17, 5  ;;  %v740_v30 = vrot.slane %v738_v18, 4  ;;  %615 = vst [vmem:[#allocation2 + $0x20] sm:$0x1] %v614_v25 }
  0x95   : > { %v744_v31 = vshll.u32 %v713_v23, 16  ;;  %v5102_v32 = vld [vmem:[#allocation2 + $0x10] sm:$0xf]  ;;  %v476_v33 = vshrl.u32 %v5091_v13, 16  ;;  %v1783_v38 = vld [vmem:[#allocation2 + $0xc] sm:$0xf] }
  0x96   : > { %v727_v35 = vrot.slane %v725_v26, 4  ;;  %v730_v36 = vrot.slane %v728_v27, 5  ;;  %v741_v37 = vor.u32 %v740_v30, %v736_v29  ;;  %v5105_v40 = vld [vmem:[#allocation2 + $0x14] sm:$0x1]  ;;  %v1808_v43 = vshrl.u32 %v1783_v38, 16  ;;  %s3514_s18 = scalar_lea.sflag [#allocation5], %s5004_s7 }
  0x97   : > { %v746_v42 = vrot.slane %v744_v31, 5  ;;  %v1811_v44 = vshll.u32 %v1783_v38, 16  ;;  %v1817_v45 = vshll.u32 %v5102_v32, 16  ;;  %v1821_v48 = vshrl.u32 %v5102_v32, 16  ;;  %v5116_v50 = vld [vmem:[#allocation2 + $0xc] sm:$0xf] }
  0x98   : > { %v731_v46 = vor.u32 %v730_v36, %v727_v35  ;;  %v742_v47 = vrot.slane %v741_v37, 4  ;;  %v1827_v49 = vshll.u32 %v5105_v40, 16  ;;  %v1810_v51 = vrot.slane %v1808_v43, 4  ;;  %v5118_v54 = vld [vmem:[#allocation2 + $0x10] sm:$0xf]  ;;  %s4679_s2 = scalar_lea.vmem %s5935_s22, 1024 }
  0x99   : > { %v1813_v52 = vrot.slane %v1811_v44, 5  ;;  %v1819_v53 = vrot.slane %v1817_v45, 5  ;;  %v5120_v55 = vrot.slane %v476_v33, 7  ;;  %v1823_v58 = vrot.slane %v1821_v48, 4  ;;  %v5125_v62 = vld [vmem:[#allocation2 + $0x14] sm:$0x1]  ;;  %p4680_p5 = scmp.ne.s32.totalorder %s5935_s22, %s4679_s2 }
  0x9a   : > { %v732_v56 = vrot.slane %v731_v46, 4  ;;  %v747_v57 = vsel %vm5109_vm12, %v742_v47, %v746_v42  ;;  %v479_v59 = vshll.u32 %v5091_v13, 16  ;;  %v1829_v61 = vrot.slane %v1827_v49, 5  ;;  %v1786_v11 = vld [vmem:[#allocation2 + $0x18] sm:$0xf]  ;;  %s4776_s12 = smov [#allocation9]  }
  0x9b   : > { %v1814_v60 = vor.u32 %v1813_v52, %v1810_v51  ;;  %v749_v63 = vshrl.u32 %v5116_v50, 16  ;;  %v752_v2 = vshll.u32 %v5116_v50, 16  ;;  %v1824_v4 = vor.u32 %v1823_v58, %v1819_v53  ;;  %v5134_v16 = vld [vmem:[#allocation2 + $0x1c] sm:$0xf]  ;;  %v5141_v21 = vld [vmem:[#allocation2 + $0x20] sm:$0x1]  ;;  %p4681_p9 = pnand %p4680_p5, %p4899_p10 }
  0x9c   : > { %v737_v3 = vsel %vm5109_vm12, %v732_v56, %v736_v29  ;;  %v758_v5 = vshll.u32 %v5118_v54, 16  ;;  %v762_v6 = vshrl.u32 %v5118_v54, 16  ;;  %v768_v15 = vshll.u32 %v5125_v62, 16  ;;  %v693_v27 = vld [vmem:[#allocation2 + $0x18] sm:$0xf]  ;;  %s4683_s6 = sshll.u32 %s4776_s12, 4  ;;  %s4684_s6 = int_to_ptr.vmem [resolvable:$false] %s4683_s6 }
  0x9d   : > { %v3690_v7 = vcombine.low %v737_v3, %v747_v57  ;;  %v1815_v8 = vrot.slane %v1814_v60, 4  ;;  %v751_v9 = vrot.slane %v749_v63, 4  ;;  %v754_v10 = vrot.slane %v752_v2, 5  ;;  %v694_v35 = vld [vmem:[#allocation2 + $0x1c] sm:$0xf]  ;;  %p4682_p1 = pneg %p4681_p9  ;;  %s4685_s26 = scalar_lea.vmem %s4684_s6, 2048 }
  0x9e   : > { %v1825_v12 = vrot.slane %v1824_v4, 4  ;;  %v760_v13 = vrot.slane %v758_v5, 5  ;;  %v764_v14 = vrot.slane %v762_v6, 4  ;;  %v2227_v18 = vrot.slane %v5102_v32, 5  ;;  %v715_v46 = vld [vmem:[#allocation2 + $0x20] sm:$0x1]  ;;  %p4686_p2 = scmp.lt.s32.totalorder %s5935_s22, %s4684_s6  ;;  %p4687_p7 = scmp.lt.s32.totalorder %s4685_s26, %s4679_s2 }
  0x9f   : > { %4099 = vmatprep.mubr.msk.bf16.mxu1 %vm973_vm11, %v3690_v7  ;;  %v1820_v17 = vsel %vm5109_vm12, %v1815_v8, %v1819_v53  ;;  %v2230_v19 = vrot.slane %v5105_v40, 5  ;;  %v755_v20 = vor.u32 %v754_v10, %v751_v9  ;;  %v770_v25 = vrot.slane %v768_v15, 5  ;;  %v4536_v53 = vld [vmem:[#allocation8 + $0x8] sm:$0xff]   ;;  %v341_v4 = vld [vmem:[#allocation2 + $0x30] sm:$0x1] }
  0xa0   : > { %v1830_v22 = vsel %vm5109_vm12, %v1825_v12, %v1829_v61  ;;  %v765_v23 = vor.u32 %v764_v14, %v760_v13  ;;  %v1832_v26 = vshrl.u32 %v1786_v11, 16  ;;  %v1835_v31 = vshll.u32 %v1786_v11, 16  ;;  %v430_v61 = vld [vmem:[%s5010_s5 + $0x14] sm:$0xf]  ;;  %v616_v9 = vld [vmem:[#allocation2 + $0x24] sm:$0xf]  ;;  %p4688_p4 = por %p4687_p7, %p4686_p2 }
  0xa1   : > { %v3778_v29 = vcombine.low %v1820_v17, %v1830_v22  ;;  %v756_v30 = vrot.slane %v755_v20, 4  ;;  %v1841_v33 = vshll.u32 %v5134_v16, 16  ;;  %v1845_v38 = vshrl.u32 %v5134_v16, 16  ;;  %v373_v14 = vld [vmem:[#allocation2 + $0x38] sm:$0x1] }
  0xa2   : > { %v766_v36 = vrot.slane %v765_v23, 4  ;;  %v1834_v37 = vrot.slane %v1832_v26, 4  ;;  %v1851_v42 = vshll.u32 %v5141_v21, 16  ;;  %v1837_v44 = vrot.slane %v1835_v31, 5  ;;  %v431_v23 = vld [vmem:[%s5010_s5 + $0x18] sm:$0xf]  ;;  %p4689_p8 = pnand %p4688_p4, %p4682_p1 }
  0xa3   : > { %4195 = vmatprep.mubr.msk.bf16.mxu0 %vm973_vm11, %v3778_v29  ;;  %v761_v43 = vsel %vm5109_vm12, %v756_v30, %v760_v13  ;;  %v1843_v45 = vrot.slane %v1841_v33, 5  ;;  %v481_v47 = vor.u32 %v479_v59, %v5120_v55  ;;  %v1847_v49 = vrot.slane %v1845_v38, 4  ;;  %v620_v29 = vld [vmem:[#allocation2 + $0x2c] sm:$0x1]  ;;  %v432_v30 = vld [vmem:[%s5010_s5 + $0x1c] sm:$0xf] }
  0xa4   : > { %v771_v48 = vsel %vm5109_vm12, %v766_v36, %v770_v25  ;;  %v1853_v51 = vrot.slane %v1851_v42, 5  ;;  %v2234_v52 = vrot.slane %v5134_v16, 5  ;;  %v1838_v57 = vor.u32 %v1837_v44, %v1834_v37  ;;  %v4539_v25 = vld [vmem:[#allocation8 + $0x10] sm:$0xff]   ;;  %v4535_v33 = vld [vmem:[#allocation8 + $0xa8] sm:$0xff]  }
  0xa5   : > { %v3691_v56 = vcombine.low %v761_v43, %v771_v48  ;;  %v2237_v58 = vrot.slane %v5141_v21, 5  ;;  %v773_v60 = vshrl.u32 %v693_v27, 16  ;;  %v1848_v63 = vor.u32 %v1847_v49, %v1843_v45  ;;  %v2193_v38 = vld [vmem:[#allocation2 + $0xc] sm:$0xe]  ;;  %v1280_v39 = vld [vmem:[#allocation2] sm:$0xe] }
  0xa6   : > { %v776_v2 = vshll.u32 %v693_v27, 16  ;;  %v782_v3 = vshll.u32 %v694_v35, 16  ;;  %v786_v59 = vshrl.u32 %v694_v35, 16  ;;  %v1839_v5 = vrot.slane %v1838_v57, 4  ;;  %v5174_v57 = vld [vmem:[%s5010_s5 + $0x20] sm:$0xf] }
  0xa7   : > { %4100 = vmatmul.mubr.msk.bf16.vlgmr.msra.gmra.mrb[0].mxu1 %vm973_vm11, %v3691_v56  ;;  %v775_v6 = vrot.slane %v773_v60, 4  ;;  %v792_v7 = vshll.u32 %v715_v46, 16  ;;  %v482_v8 = vrot.slane %v5120_v55, 4  ;;  %v1849_v10 = vrot.slane %v1848_v63, 4  ;;  %v344_v46 = vld [vmem:[#allocation2 + $0x3c] sm:$0x1] }
  0xa8   : > { %4116 = vmatpush3.bf16.msra.mxu1 %v5044_v24  ;;  %v778_v11 = vrot.slane %v776_v2, 5  ;;  %v784_v12 = vrot.slane %v782_v3, 5  ;;  %v788_v13 = vrot.slane %v786_v59, 4  ;;  %v1844_v15 = vsel %vm5109_vm12, %v1839_v5, %v1843_v45  ;;  %v4541_v60 = vld [vmem:[#allocation8 + $0x18] sm:$0xff]   ;;  %v4537_v5 = vld [vmem:[#allocation8 + $0xb0] sm:$0xff]  }
  0xa9   : > { %v794_v17 = vrot.slane %v792_v7, 5  ;;  %4117 = vmatprep.subr.bf16.mxu1 %v4536_v53  ;;  %v484_v20 = vshrl.u32 %v430_v61, 16  ;;  %v487_v22 = vshll.u32 %v430_v61, 16  ;;  %v1854_v55 = vsel %vm5109_vm12, %v1849_v10, %v1853_v51  ;;  %v5900_v2 = vld [vmem:[%s5989_s3] ss:$0 sm:$0xff] }
  0xaa   : > { %v779_v26 = vor.u32 %v778_v11, %v775_v6  ;;  %v789_v24 = vor.u32 %v788_v13, %v784_v12  ;;  %v617_v27 = vsel %vm5062_vm8, %v481_v47, %v616_v9  ;;  %v3779_v31 = vcombine.low %v1844_v15, %v1854_v55  ;;  %v376_v47 = vld [vmem:[#allocation2 + $0x44] sm:$0x1]  ;;  %v4538_v13 = vld [vmem:[#allocation8 + $0xb8] sm:$0xff]  }
  0xab   : > { %v486_v35 = vrot.slane %v484_v20, 7  ;;  %618 = vst [vmem:[#allocation2 + $0x24] sm:$0xf] %v617_v27  ;;  %v342_v36 = vsel %vm5029_vm3, 0, %v341_v4  ;;  %v374_v37 = vsel %vm5034_vm4, 0, %v373_v14  ;;  %v493_v44 = vshrl.u32 %v431_v23, 16 }
  0xac   : > { %v780_v42 = vrot.slane %v779_v26, 4  ;;  %v790_v43 = vrot.slane %v789_v24, 4  ;;  %4118 = vmatpush3.bf16.msra.mxu1 %v4536_v53  ;;  %343 = vst [vmem:[#allocation2 + $0x30] sm:$0x1] %v342_v36  ;;  %375 = vst [vmem:[#allocation2 + $0x38] sm:$0x1] %v374_v37  ;;  %4196 = vmatmul.mubr.msk.bf16.vlgmr.msra.gmra.mrb[0].mxu0 %vm973_vm11, %v3779_v31 }
  0xad   : > { %v496_v45 = vshll.u32 %v431_v23, 16  ;;  %v489_v48 = vor.u32 %v487_v22, %v486_v35  ;;  %v491_v49 = vrot.slane %v486_v35, 4  ;;  %v501_v51 = vshrl.u32 %v432_v30, 16  ;;  %4119 = vmatprep.subr.bf16.mxu1 %v4539_v25  ;;  %4212 = vmatpush3.bf16.msra.mxu0 %v5058_v34  ;;  %v5204_v20 = vld [vmem:[#allocation8 + $0x40] sm:$0xff]  }
  0xae   : > { %v504_v56 = vshll.u32 %v432_v30, 16  ;;  %v785_v53 = vsel %vm5109_vm12, %v780_v42, %v784_v12  ;;  %v795_v61 = vsel %vm5109_vm12, %v790_v43, %v794_v17  ;;  %v495_v63 = vrot.slane %v493_v44, 7  ;;  %4213 = vmatprep.subr.bf16.mxu0 %v4535_v33  ;;  %v5202_v17 = vld [vmem:[%s5010_s5 + $0x24] sm:$0xf] }
  0xaf   : > { %v3798_v3 = vrot.slane %v2193_v38, 9  ;;  %v3692_v59 = vcombine.low %v785_v53, %v795_v61  ;;  %v490_v4 = vsel %vm5053_vm7, %v482_v8, %v489_v48  ;;  %v621_v34 = vsel %vm5029_vm3, %v491_v49, %v620_v29  ;;  %v5237_v43 = vld [vmem:[#allocation8 + $0xc0] sm:$0xff]  }
  0xb0   : > { %v503_v6 = vrot.slane %v501_v51, 7  ;;  %v2236_v7 = vrot.slane %v2234_v52, 4  ;;  %619 = vst.msk [vmem:[#allocation2 + $0x28] sm:$0xf] %vm415_vm6, %v490_v4  ;;  %622 = vst [vmem:[#allocation2 + $0x2c] sm:$0x1] %v621_v34  ;;  %v498_v9 = vor.u32 %v496_v45, %v495_v63  ;;  %4120 = vmatpush3.bf16.msra.mxu1 %v4539_v25 }
  0xb1   : > { %v499_v10 = vrot.slane %v495_v63, 4  ;;  %v2229_v11 = vrot.slane %v2227_v18, 4  ;;  %4103 = vmatprep.mubr.msk.bf16.mxu1 %vm973_vm11, %v3692_v59  ;;  %v345_v14 = vsel %vm5029_vm3, 0, %v344_v46  ;;  %v377_v15 = vsel %vm5034_vm4, 0, %v376_v47  ;;  %4121 = vmatprep.subr.bf16.mxu1 %v4541_v60 }
  0xb2   : > { %v506_v8 = vor.u32 %v504_v56, %v503_v6  ;;  %v508_v12 = vrot.slane %v503_v6, 4  ;;  %4214 = vmatpush3.bf16.msra.mxu0 %v4535_v33  ;;  %v1789_v22 = vld [vmem:[#allocation2 + $0x24] sm:$0xf]  ;;  %v5212_v25 = vsel %vm5183_vm15, %v3798_v3, %v2227_v18  ;;  %346 = vst [vmem:[#allocation2 + $0x3c] sm:$0x1] %v345_v14  ;;  %v510_v26 = vshrl.u32 %v5174_v57, 16 }
  0xb3   : > { %v5206_v23 = vld [vmem:[#allocation2 + $0x24] sm:$0xf]  ;;  %v5218_v55 = vsel %vm5183_vm15, %v2229_v11, %v2230_v19  ;;  %378 = vst [vmem:[#allocation2 + $0x44] sm:$0x1] %v377_v15  ;;  %v513_v24 = vshll.u32 %v5174_v57, 16  ;;  %v1856_v27 = vshrl.u32 %v1789_v22, 16  ;;  %4215 = vmatprep.subr.bf16.mxu0 %v4537_v5  ;;  %v5234_v35 = vsel %vm5183_vm15, %v2236_v7, %v2237_v58 }
  0xb4   : > { %v1859_v29 = vshll.u32 %v1789_v22, 16  ;;  %v797_v32 = vshrl.u32 %v5206_v23, 16  ;;  %v800_v18 = vshll.u32 %v5206_v23, 16  ;;  %v623_v30 = vld [vmem:[#allocation2 + $0x30] sm:$0xf]  ;;  %v507_v40 = vsel %vm5053_vm7, %v499_v10, %v506_v8  ;;  %4122 = vmatpush3.bf16.msra.mxu1 %v4541_v60 }
  0xb5   : > { %v624_v19 = vsel %vm5062_vm8, %v498_v9, %v623_v30  ;;  %v627_v31 = vld [vmem:[#allocation2 + $0x38] sm:$0x1]  ;;  %v5228_v33 = vrot.slane %v510_v26, 7  ;;  %v1858_v36 = vrot.slane %v1856_v27, 4  ;;  %626 = vst.msk [vmem:[#allocation2 + $0x34] sm:$0xf] %vm415_vm6, %v507_v40  ;;  %4139 = vmatprep.subr.bf16.mxu1 %v5204_v20  ;;  %v3806_v21 = vcombine.low %v5212_v25, %v5218_v55 }
  0xb6   : > { %v1861_v37 = vrot.slane %v1859_v29, 5  ;;  %v799_v38 = vrot.slane %v797_v32, 4  ;;  %v802_v42 = vrot.slane %v800_v18, 5  ;;  %625 = vst [vmem:[#allocation2 + $0x30] sm:$0xf] %v624_v19  ;;  %v628_v44 = vsel %vm5029_vm3, %v508_v12, %v627_v31  ;;  %4216 = vmatpush3.bf16.msra.mxu0 %v4537_v5 }
  0xb7   : > { %v516_v58 = vrot.slane %v5228_v33, 4  ;;  %v518_v45 = vshrl.u32 %v5202_v17, 16  ;;  %v5246_v46 = vld [vmem:[#allocation2 + $0x28] sm:$0xf]  ;;  %v5248_v47 = vld [vmem:[#allocation2 + $0x2c] sm:$0x1]  ;;  %4217 = vmatprep.subr.bf16.mxu0 %v4538_v13  ;;  %v515_v56 = vor.u32 %v513_v24, %v5228_v33  ;;  %v3711_v57 = vcombine.low %v5116_v50, %v5118_v54 }
  0xb8   : > { %v1862_v48 = vor.u32 %v1861_v37, %v1858_v36  ;;  %v5250_v49 = vld [vmem:[#allocation2 + $0x28] sm:$0xf]  ;;  %v803_v51 = vor.u32 %v802_v42, %v799_v38  ;;  %629 = vst [vmem:[#allocation2 + $0x38] sm:$0x1] %v628_v44  ;;  %v1865_v60 = vshll.u32 %v5246_v46, 16  ;;  %v1869_v53 = vshrl.u32 %v5246_v46, 16 }
  0xb9   : > { %v1875_v61 = vshll.u32 %v5248_v47, 16  ;;  %v5258_v63 = vld [vmem:[#allocation2 + $0x2c] sm:$0x1]  ;;  %v806_v3 = vshll.u32 %v5250_v49, 16  ;;  %v810_v34 = vshrl.u32 %v5250_v49, 16  ;;  %v520_v14 = vrot.slane %v518_v45, 7 }
  0xba   : > { %v1863_v59 = vrot.slane %v1862_v48, 4  ;;  %v804_v4 = vrot.slane %v803_v51, 4  ;;  %v816_v5 = vshll.u32 %v5258_v63, 16  ;;  %v630_v6 = vld [vmem:[#allocation2 + $0x3c] sm:$0xf]  ;;  %v1867_v7 = vrot.slane %v1865_v60, 5  ;;  %4218 = vmatpush3.bf16.msra.mxu0 %v4538_v13 }
  0xbb   : > { %v1871_v9 = vrot.slane %v1869_v53, 4  ;;  %v1877_v10 = vrot.slane %v1875_v61, 5  ;;  %v808_v11 = vrot.slane %v806_v3, 5  ;;  %v812_v8 = vrot.slane %v810_v34, 4  ;;  %4235 = vmatprep.subr.bf16.mxu0 %v5237_v43 }
  0xbc   : > { %v818_v12 = vrot.slane %v816_v5, 5  ;;  %v521_v15 = vshll.u32 %v5202_v17, 16  ;;  %v1868_v22 = vsel %vm5109_vm12, %v1863_v59, %v1867_v7  ;;  %v5269_v29 = vld [vmem:[#allocation2 + $0x34] sm:$0xf]  ;;  %v631_v13 = vsel %vm5062_vm8, %v515_v56, %v630_v6 }
  0xbd   : > { %v1872_v26 = vor.u32 %v1871_v9, %v1867_v7  ;;  %v809_v24 = vsel %vm5109_vm12, %v804_v4, %v808_v11  ;;  %v1792_v27 = vld [vmem:[#allocation2 + $0x30] sm:$0xf]  ;;  %v813_v32 = vor.u32 %v812_v8, %v808_v11  ;;  %v1889_v40 = vshll.u32 %v5269_v29, 16  ;;  %632 = vst [vmem:[#allocation2 + $0x3c] sm:$0xf] %v631_v13 }
  0xbe   : > { %v1880_v18 = vshrl.u32 %v1792_v27, 16  ;;  %v1883_v30 = vshll.u32 %v1792_v27, 16  ;;  %v5274_v19 = vld [vmem:[#allocation2 + $0x30] sm:$0xf]  ;;  %v1893_v36 = vshrl.u32 %v5269_v29, 16  ;;  %v523_v38 = vor.u32 %v521_v15, %v520_v14 }
  0xbf   : > { %v1873_v17 = vrot.slane %v1872_v26, 4  ;;  %v5276_v31 = vld [vmem:[#allocation2 + $0x38] sm:$0x1]  ;;  %v5279_v37 = vld [vmem:[#allocation2 + $0x34] sm:$0xf]  ;;  %v3713_v42 = vcombine.low %v5206_v23, %v5250_v49  ;;  %v814_v44 = vrot.slane %v813_v32, 4 }
  0xc0   : > { %v1882_v45 = vrot.slane %v1880_v18, 4  ;;  %v1885_v48 = vrot.slane %v1883_v30, 5  ;;  %v1891_v51 = vrot.slane %v1889_v40, 5  ;;  %v5283_v56 = vld [vmem:[#allocation2 + $0x38] sm:$0x1]  ;;  %v1895_v53 = vrot.slane %v1893_v36, 4 }
  0xc1   : > { %v1878_v60 = vsel %vm5109_vm12, %v1873_v17, %v1877_v10  ;;  %v1899_v61 = vshll.u32 %v5276_v31, 16  ;;  %v821_v3 = vshrl.u32 %v5274_v19, 16  ;;  %v819_v4 = vsel %vm5109_vm12, %v814_v44, %v818_v12  ;;  %v634_v27 = vld [vmem:[#allocation2 + $0x44] sm:$0x1]  ;;  %v347_v44 = vld [vmem:[#allocation2 + $0x48] sm:$0x1] }
  0xc2   : > { %v3780_v59 = vcombine.low %v1868_v22, %v1878_v60  ;;  %v1886_v34 = vor.u32 %v1885_v48, %v1882_v45  ;;  %v824_v5 = vshll.u32 %v5274_v19, 16  ;;  %v3693_v6 = vcombine.low %v809_v24, %v819_v4  ;;  %v2194_v22 = vld [vmem:[#allocation2 + $0x18] sm:$0xe]  ;;  %v379_v45 = vld [vmem:[#allocation2 + $0x50] sm:$0x1] }
  0xc3   : > { %v1896_v7 = vor.u32 %v1895_v53, %v1891_v51  ;;  %v1901_v9 = vrot.slane %v1899_v61, 5  ;;  %v823_v11 = vrot.slane %v821_v3, 4  ;;  %v830_v15 = vshll.u32 %v5279_v37, 16  ;;  %v436_v60 = vld [vmem:[%s5010_s5 + $0x2c] sm:$0xf] }
  0xc4   : > { %4199 = vmatprep.mubr.msk.bf16.mxu0 %vm973_vm11, %v3780_v59  ;;  %v1887_v8 = vrot.slane %v1886_v34, 4  ;;  %v826_v10 = vrot.slane %v824_v5, 5  ;;  %v834_v26 = vshrl.u32 %v5279_v37, 16  ;;  %4104 = vmatmul.mubr.msk.bf16.gmra.mrb[4].mxu1 %vm973_vm11, %v3693_v6  ;;  %v840_v13 = vshll.u32 %v5283_v56, 16  ;;  %v5301_v18 = vld [vmem:[#allocation2 + $0x3c] sm:$0xf] }
  0xc5   : > { %v1897_v12 = vrot.slane %v1896_v7, 4  ;;  %v524_v24 = vsel %vm5053_vm7, %v516_v58, %v523_v38  ;;  %v525_v32 = vrot.slane %v520_v14, 4  ;;  %v832_v17 = vrot.slane %v830_v15, 5  ;;  %v435_v38 = vld [vmem:[%s5010_s5 + $0x28] sm:$0xf] }
  0xc6   : > { %v1892_v30 = vsel %vm5109_vm12, %v1887_v8, %v1891_v51  ;;  %v827_v40 = vor.u32 %v826_v10, %v823_v11  ;;  %v836_v36 = vrot.slane %v834_v26, 4  ;;  %633 = vst.msk [vmem:[#allocation2 + $0x40] sm:$0xf] %vm415_vm6, %v524_v24  ;;  %v842_v48 = vrot.slane %v840_v13, 5  ;;  %v2195_v59 = vld [vmem:[#allocation2 + $0x24] sm:$0xe] }
  0xc7   : > { %v1902_v33 = vsel %vm5109_vm12, %v1897_v12, %v1901_v9  ;;  %v635_v58 = vsel %vm5029_vm3, %v525_v32, %v634_v27  ;;  %v845_v14 = vshrl.u32 %v5301_v18, 16  ;;  %v848_v3 = vshll.u32 %v5301_v18, 16  ;;  %v350_v32 = vld [vmem:[#allocation2 + $0x54] sm:$0x1]  ;;  %v2702_v23 = vld [vmem:[#allocation2 + $0x18] sm:$0xf] }
  0xc8   : > { %v3781_v53 = vcombine.low %v1892_v30, %v1902_v33  ;;  %v828_v51 = vrot.slane %v827_v40, 4  ;;  %v837_v61 = vor.u32 %v836_v36, %v832_v17  ;;  %636 = vst [vmem:[#allocation2 + $0x44] sm:$0x1] %v635_v58  ;;  %v3799_v34 = vrot.slane %v2194_v22, 9  ;;  %v437_v33 = vld [vmem:[%s5010_s5 + $0x30] sm:$0xf] }
  0xc9   : > { %v847_v4 = vrot.slane %v845_v14, 4  ;;  %v348_v5 = vsel %vm5029_vm3, 0, %v347_v44  ;;  %v380_v6 = vsel %vm5034_vm4, 0, %v379_v45  ;;  %v850_v11 = vrot.slane %v848_v3, 5  ;;  %v4542_v44 = vld [vmem:[#allocation8 + $0xc8] sm:$0xff]  }
  0xca   : > { %4200 = vmatmul.mubr.msk.bf16.gmra.mrb[4].mxu0 %vm973_vm11, %v3781_v53  ;;  %v833_v7 = vsel %vm5109_vm12, %v828_v51, %v832_v17  ;;  %v838_v9 = vrot.slane %v837_v61, 4  ;;  %349 = vst [vmem:[#allocation2 + $0x48] sm:$0x1] %v348_v5  ;;  %381 = vst [vmem:[#allocation2 + $0x50] sm:$0x1] %v380_v6  ;;  %v527_v8 = vshrl.u32 %v435_v38, 16  ;;  %v2235_v10 = vsel %vm5183_vm15, %v3799_v34, %v2234_v52 }
  0xcb   : > { %4219 = vmatprep.mubr.msk.bf16.mxu0 %vm973_vm11, %v3806_v21  ;;  %v530_v15 = vshll.u32 %v435_v38, 16  ;;  %v535_v26 = vshrl.u32 %v436_v60, 16  ;;  %v538_v27 = vshll.u32 %v436_v60, 16  ;;  %v851_v12 = vor.u32 %v850_v11, %v847_v4  ;;  %v382_v45 = vld [vmem:[#allocation2 + $0x5c] sm:$0x1] }
  0xcc   : > { %v843_v22 = vsel %vm5109_vm12, %v838_v9, %v842_v48  ;;  %v3807_v13 = vcombine.low %v2235_v10, %v5234_v35  ;;  %v529_v24 = vrot.slane %v527_v8, 7  ;;  %v3800_v21 = vrot.slane %v2195_v59, 9  ;;  %v438_v38 = vld [vmem:[%s5010_s5 + $0x34] sm:$0xf]  ;;  %v2196_v61 = vld [vmem:[#allocation2 + $0x30] sm:$0xe] }
  0xcd   : > { %v3694_v25 = vcombine.low %v833_v7, %v843_v22  ;;  %v5332_v55 = vld [vmem:[#allocation2 + $0x40] sm:$0xf]  ;;  %v537_v16 = vrot.slane %v535_v26, 7  ;;  %v2241_v52 = vrot.slane %v5246_v46, 5  ;;  %v852_v30 = vrot.slane %v851_v12, 4 }
  0xce   : > { %v854_v40 = vshll.u32 %v5332_v55, 16  ;;  %v858_v17 = vshrl.u32 %v5332_v55, 16  ;;  %v532_v36 = vor.u32 %v530_v15, %v529_v24  ;;  %v533_v48 = vrot.slane %v529_v24, 4  ;;  %v2197_v10 = vld [vmem:[#allocation2 + $0x3c] sm:$0xe] }
  0xcf   : > { %4107 = vmatprep.mubr.msk.bf16.mxu1 %vm973_vm11, %v3694_v25  ;;  %v5339_v35 = vld [vmem:[#allocation2 + $0x44] sm:$0x1]  ;;  %v540_v58 = vor.u32 %v538_v27, %v537_v16  ;;  %v542_v14 = vrot.slane %v537_v16, 4  ;;  %v2243_v51 = vrot.slane %v2241_v52, 4  ;;  %v2242_v34 = vsel %vm5183_vm15, %v3800_v21, %v2241_v52  ;;  %v1796_v22 = vld [vmem:[#allocation2 + $0x40] sm:$0xf] }
  0xd0   : > { %v856_v60 = vrot.slane %v854_v40, 5  ;;  %v860_v53 = vrot.slane %v858_v17, 4  ;;  %v864_v46 = vshll.u32 %v5339_v35, 16  ;;  %v2244_v5 = vrot.slane %v5248_v47, 5  ;;  %v353_v25 = vld [vmem:[#allocation2 + $0x60] sm:$0x1] }
  0xd1   : > { %v541_v3 = vsel %vm5053_vm7, %v533_v48, %v540_v58  ;;  %v637_v59 = vld [vmem:[#allocation2 + $0x48] sm:$0xf]  ;;  %v641_v4 = vld [vmem:[#allocation2 + $0x50] sm:$0x1]  ;;  %v351_v6 = vsel %vm5029_vm3, 0, %v350_v32  ;;  %v383_v26 = vsel %vm5034_vm4, 0, %v382_v45 }
  0xd2   : > { %v857_v7 = vsel %vm5109_vm12, %v852_v30, %v856_v60  ;;  %v861_v9 = vor.u32 %v860_v53, %v856_v60  ;;  %v866_v11 = vrot.slane %v864_v46, 5  ;;  %4220 = vmatmul.mubr.msk.bf16.vlgmr.msra.gmra.mrb[0].mxu0 %vm973_vm11, %v3807_v13  ;;  %v638_v8 = vsel %vm5062_vm8, %v532_v36, %v637_v59  ;;  %640 = vst.msk [vmem:[#allocation2 + $0x4c] sm:$0xf] %vm415_vm6, %v541_v3  ;;  %v1797_v45 = vld [vmem:[#allocation2 + $0x44] sm:$0x1] }
  0xd3   : > { %352 = vst [vmem:[#allocation2 + $0x54] sm:$0x1] %v351_v6  ;;  %4236 = vmatpush3.bf16.msra.mxu0 %v5237_v43  ;;  %639 = vst [vmem:[#allocation2 + $0x48] sm:$0xf] %v638_v8  ;;  %v642_v47 = vsel %vm5029_vm3, %v542_v14, %v641_v4  ;;  %v2245_v15 = vsel %vm5183_vm15, %v2243_v51, %v2244_v5  ;;  %v544_v27 = vshrl.u32 %v437_v33, 16  ;;  %v547_v24 = vshll.u32 %v437_v33, 16 }
  0xd4   : > { %v862_v12 = vrot.slane %v861_v9, 4  ;;  %643 = vst [vmem:[#allocation2 + $0x50] sm:$0x1] %v642_v47  ;;  %v3808_v13 = vcombine.low %v2242_v34, %v2245_v15  ;;  %4237 = vmatprep.subr.bf16.mxu0 %v4542_v44  ;;  %384 = vst [vmem:[#allocation2 + $0x5c] sm:$0x1] %v383_v26  ;;  %v552_v32 = vshrl.u32 %v438_v38, 16 }
  0xd5   : > { %v4544_v43 = vld [vmem:[#allocation8 + $0xd0] sm:$0xff]   ;;  %v546_v16 = vrot.slane %v544_v27, 7  ;;  %v555_v21 = vshll.u32 %v438_v38, 16  ;;  %v3801_v52 = vrot.slane %v2196_v61, 9  ;;  %v2248_v30 = vrot.slane %v5269_v29, 5  ;;  %v4546_v29 = vld [vmem:[#allocation8 + $0xd8] sm:$0xff]  }
  0xd6   : > { %v867_v40 = vsel %vm5109_vm12, %v862_v12, %v866_v11  ;;  %4223 = vmatprep.mubr.msk.bf16.mxu0 %vm973_vm11, %v3808_v13  ;;  %v554_v17 = vrot.slane %v552_v32, 7  ;;  %v2251_v36 = vrot.slane %v5276_v31, 5  ;;  %v3802_v14 = vrot.slane %v2197_v10, 9 }
  0xd7   : > { %v3695_v48 = vcombine.low %v857_v7, %v867_v40  ;;  %v549_v58 = vor.u32 %v547_v24, %v546_v16  ;;  %v550_v33 = vrot.slane %v546_v16, 4  ;;  %4238 = vmatpush3.bf16.msra.mxu0 %v4542_v44  ;;  %v2250_v38 = vrot.slane %v2248_v30, 4 }
  0xd8   : > { %v557_v60 = vor.u32 %v555_v21, %v554_v17  ;;  %v559_v53 = vrot.slane %v554_v17, 4  ;;  %v2255_v46 = vrot.slane %v1796_v22, 5  ;;  %4239 = vmatprep.subr.bf16.mxu0 %v4544_v43  ;;  %v2249_v31 = vsel %vm5183_vm15, %v3801_v52, %v2248_v30  ;;  %v5397_v21 = vld [vmem:[#allocation8 + $0xe0] sm:$0xff]  }
  0xd9   : > { %4108 = vmatmul.mubr.msk.bf16.gmra.mrb[8].mxu1 %vm973_vm11, %v3695_v48  ;;  %v5369_v51 = vld [vmem:[#allocation2 + $0x4c] sm:$0xf]  ;;  %v2258_v3 = vrot.slane %v1797_v45, 5  ;;  %v354_v59 = vsel %vm5029_vm3, 0, %v353_v25  ;;  %v2252_v10 = vsel %vm5183_vm15, %v2250_v38, %v2251_v36  ;;  %v1316_v36 = vrot.slane %v5118_v54, 5 }
  0xda   : > { %v644_v61 = vld [vmem:[#allocation2 + $0x54] sm:$0xf]  ;;  %v5375_v44 = vld [vmem:[#allocation2 + $0x48] sm:$0xf]  ;;  %v878_v4 = vshll.u32 %v5369_v51, 16  ;;  %v882_v34 = vshrl.u32 %v5369_v51, 16  ;;  %v558_v5 = vsel %vm5053_vm7, %v550_v33, %v557_v60  ;;  %v2256_v47 = vsel %vm5183_vm15, %v3802_v14, %v2255_v46 }
  0xdb   : > { %v645_v6 = vsel %vm5062_vm8, %v549_v58, %v644_v61  ;;  %355 = vst [vmem:[#allocation2 + $0x60] sm:$0x1] %v354_v59  ;;  %v5383_v7 = vld [vmem:[#allocation2 + $0x50] sm:$0x1]  ;;  %v869_v9 = vshrl.u32 %v5375_v44, 16  ;;  %v872_v11 = vshll.u32 %v5375_v44, 16  ;;  %4240 = vmatpush3.bf16.msra.mxu0 %v4544_v43  ;;  %v3809_v32 = vcombine.low %v2249_v31, %v2252_v10 }
  0xdc   : > { %646 = vst [vmem:[#allocation2 + $0x54] sm:$0xf] %v645_v6  ;;  %647 = vst.msk [vmem:[#allocation2 + $0x58] sm:$0xf] %vm415_vm6, %v558_v5  ;;  %v648_v8 = vld [vmem:[#allocation2 + $0x5c] sm:$0x1]  ;;  %4241 = vmatprep.subr.bf16.mxu0 %v4546_v29 }
  0xdd   : > { %v880_v15 = vrot.slane %v878_v4, 5  ;;  %v884_v26 = vrot.slane %v882_v34, 4  ;;  %v888_v27 = vshll.u32 %v5383_v7, 16  ;;  %v649_v22 = vsel %vm5029_vm3, %v559_v53, %v648_v8  ;;  %v5395_v12 = vld [vmem:[#allocation2 + $0x4c] sm:$0xf]  ;;  %4224 = vmatmul.mubr.msk.bf16.gmra.mrb[4].mxu0 %vm973_vm11, %v3809_v32 }
  0xde   : > { %v871_v13 = vrot.slane %v869_v9, 4  ;;  %v874_v24 = vrot.slane %v872_v11, 5  ;;  %650 = vst [vmem:[#allocation2 + $0x5c] sm:$0x1] %v649_v22  ;;  %v2257_v25 = vrot.slane %v2255_v46, 4  ;;  %v1937_v30 = vshll.u32 %v5395_v12, 16 }
  0xdf   : > { %v2198_v16 = vld [vmem:[#allocation2 + $0x48] sm:$0xe]  ;;  %v885_v52 = vor.u32 %v884_v26, %v880_v15  ;;  %v890_v43 = vrot.slane %v888_v27, 5  ;;  %4242 = vmatpush3.bf16.msra.mxu0 %v4546_v29  ;;  %v5404_v14 = vld [vmem:[#allocation2 + $0x50] sm:$0x1]  ;;  %v1941_v53 = vshrl.u32 %v5395_v12, 16 }
  0xe0   : > { %v875_v40 = vor.u32 %v874_v24, %v871_v13  ;;  %v2259_v17 = vsel %vm5183_vm15, %v2257_v25, %v2258_v3  ;;  %v3803_v58 = vrot.slane %v2198_v16, 9  ;;  %v5406_v60 = vrot.slane %v1937_v30, 5  ;;  %4259 = vmatprep.subr.bf16.mxu0 %v5397_v21  ;;  %v385_v3 = vld [vmem:[#allocation2 + $0x68] sm:$0x1]  ;;  %v2711_v54 = vld [vmem:[#allocation2 + $0x3c] sm:$0xf] }
  0xe1   : > { %v886_v45 = vrot.slane %v885_v52, 4  ;;  %v3810_v48 = vcombine.low %v2256_v47, %v2259_v17  ;;  %v2262_v38 = vrot.slane %v5395_v12, 5  ;;  %v2265_v47 = vrot.slane %v5404_v14, 5  ;;  %v440_v52 = vld [vmem:[%s5010_s5 + $0x3c] sm:$0xf] }
  0xe2   : > { %v876_v33 = vrot.slane %v875_v40, 4  ;;  %v386_v17 = vsel %vm5034_vm4, 0, %v385_v3  ;;  %v572_v3 = vshll.u32 %v440_v52, 16 }
  0xe3   : > { %v891_v46 = vsel %vm5109_vm12, %v886_v45, %v890_v43  ;;  %v5413_v61 = vld [vmem:[#allocation2 + $0x54] sm:$0xf]  ;;  %v5415_v31 = vld [vmem:[#allocation2 + $0x58] sm:$0xf]  ;;  %4227 = vmatprep.mubr.msk.bf16.mxu0 %vm973_vm11, %v3810_v48  ;;  %v2263_v10 = vsel %vm5183_vm15, %v3803_v58, %v2262_v38  ;;  %v2264_v32 = vrot.slane %v2262_v38, 4 }
  0xe4   : > { %v1802_v29 = vld [vmem:[#allocation2 + $0x58] sm:$0xf]  ;;  %v881_v59 = vsel %vm5109_vm12, %v876_v33, %v880_v15  ;;  %v893_v4 = vshrl.u32 %v5413_v61, 16  ;;  %v896_v34 = vshll.u32 %v5413_v61, 16  ;;  %v902_v5 = vshll.u32 %v5415_v31, 16 }
  0xe5   : > { %v2199_v6 = vld [vmem:[#allocation2 + $0x54] sm:$0xe]  ;;  %v3696_v9 = vcombine.low %v881_v59, %v891_v46  ;;  %v5423_v11 = vld [vmem:[#allocation2 + $0x5c] sm:$0x1]  ;;  %v906_v8 = vshrl.u32 %v5415_v31, 16  ;;  %v2269_v16 = vrot.slane %v1802_v29, 5  ;;  %v2266_v48 = vsel %vm5183_vm15, %v2264_v32, %v2265_v47 }
  0xe6   : > { %v1803_v26 = vld [vmem:[#allocation2 + $0x5c] sm:$0x1]  ;;  %v439_v15 = vld [vmem:[%s5010_s5 + $0x38] sm:$0xf]  ;;  %v895_v27 = vrot.slane %v893_v4, 4  ;;  %v898_v22 = vrot.slane %v896_v34, 5  ;;  %v3811_v59 = vcombine.low %v2263_v10, %v2266_v48 }
  0xe7   : > { %v904_v12 = vrot.slane %v902_v5, 5  ;;  %v912_v13 = vshll.u32 %v5423_v11, 16  ;;  %4111 = vmatprep.mubr.msk.bf16.mxu1 %vm973_vm11, %v3696_v9  ;;  %v908_v24 = vrot.slane %v906_v8, 4  ;;  %v3804_v25 = vrot.slane %v2199_v6, 9  ;;  %387 = vst [vmem:[#allocation2 + $0x68] sm:$0x1] %v386_v17 }
  0xe8   : > { %v899_v43 = vor.u32 %v898_v22, %v895_v27  ;;  %v2272_v40 = vrot.slane %v1803_v26, 5  ;;  %v2271_v33 = vrot.slane %v2269_v16, 4  ;;  %v1281_v46 = vld [vmem:[#allocation2 + $0xc] sm:$0xe]  ;;  %v561_v29 = vshrl.u32 %v439_v15, 16  ;;  %4228 = vmatmul.mubr.msk.bf16.gmra.mrb[8].mxu0 %vm973_vm11, %v3811_v59 }
  0xe9   : > { %v914_v30 = vrot.slane %v912_v13, 5  ;;  %v909_v45 = vor.u32 %v908_v24, %v904_v12  ;;  %v2270_v58 = vsel %vm5183_vm15, %v3804_v25, %v2269_v16  ;;  %v564_v4 = vshll.u32 %v439_v15, 16  ;;  %v5447_v15 = vld [vmem:[#allocation2 + $0x4] sm:$0xf]  ;;  %v4578_v22 = vld [vmem:[#allocation2] sm:$0xf] }
  0xea   : > { %v900_v38 = vrot.slane %v899_v43, 4  ;;  %v2273_v5 = vsel %vm5183_vm15, %v2271_v33, %v2272_v40  ;;  %v569_v6 = vshrl.u32 %v440_v52, 16  ;;  %v1943_v8 = vrot.slane %v1941_v53, 4  ;;  %v651_v32 = vld [vmem:[#allocation2 + $0x60] sm:$0xf] }
  0xeb   : > { %v910_v34 = vrot.slane %v909_v45, 4  ;;  %v3812_v47 = vcombine.low %v2270_v58, %v2273_v5  ;;  %v563_v26 = vrot.slane %v561_v29, 7  ;;  %v1319_v27 = vrot.slane %v5125_v62, 5  ;;  %v1283_v40 = vld [vmem:[#allocation2 + $0x24] sm:$0xe] }
  0xec   : > { %v905_v9 = vsel %vm5109_vm12, %v900_v38, %v904_v12  ;;  %v3710_v13 = vcombine.low %v4578_v22, %v5447_v15  ;;  %v571_v24 = vrot.slane %v569_v6, 7  ;;  %v3731_v16 = vrot.slane %v1281_v46, 9  ;;  %v356_v46 = vld [vmem:[#allocation2 + $0x6c] sm:$0x1]  ;;  %v3688_v38 = vld [vmem:[%s5018_s8 + $0x8] sm:$0xf] }
  0xed   : > { %v915_v10 = vsel %vm5109_vm12, %v910_v34, %v914_v30  ;;  %4231 = vmatprep.mubr.msk.bf16.mxu0 %vm973_vm11, %v3812_v47  ;;  %v566_v53 = vor.u32 %v564_v4, %v563_v26  ;;  %v567_v12 = vrot.slane %v563_v26, 4  ;;  %v1947_v52 = vshll.u32 %v5404_v14, 16  ;;  %v1284_v4 = vld [vmem:[#allocation2 + $0x30] sm:$0xe]  ;;  %v4579_v5 = vld [vmem:[#allocation2 + $0x18] sm:$0xf] }
  0xee   : > { %v3697_v25 = vcombine.low %v905_v9, %v915_v10  ;;  %v574_v62 = vor.u32 %v572_v3, %v571_v24  ;;  %v576_v43 = vrot.slane %v571_v24, 4  ;;  %v1944_v30 = vor.u32 %v1943_v8, %v5406_v60  ;;  %v655_v45 = vld [vmem:[#allocation2 + $0x68] sm:$0x1]  ;;  %v5478_v6 = vld [vmem:[#allocation2 + $0x1c] sm:$0xf] }
  0xef   : > { %v652_v17 = vsel %vm5062_vm8, %v566_v53, %v651_v32  ;;  %v5460_v48 = vsel %vm5183_vm15, %v3731_v16, %v1316_v36  ;;  %v1318_v14 = vrot.slane %v1316_v36, 4  ;;  %v3733_v29 = vrot.slane %v1283_v40, 9  ;;  %v3689_v36 = vld [vmem:[%s5018_s8 + $0xc] sm:$0xf] }
  0xf0   : > { %4112 = vmatmul.mubr.msk.bf16.gmra.mrb[12].mxu1 %vm973_vm11, %v3697_v25  ;;  %v575_v58 = vsel %vm5053_vm7, %v567_v12, %v574_v62  ;;  %653 = vst [vmem:[#allocation2 + $0x60] sm:$0xf] %v652_v17  ;;  %v656_v33 = vsel %vm5029_vm3, %v576_v43, %v655_v45  ;;  %v5476_v34 = vrot.slane %v1947_v52, 5  ;;  %v3712_v3 = vcombine.low %v4579_v5, %v5478_v6  ;;  %v4545_v25 = vld [vmem:[#allocation8 + $0x48] sm:$0xff]  }
  0xf1   : > { %4123 = vmatprep.mubr.msk.bf16.mxu1 %vm973_vm11, %v3710_v13  ;;  %654 = vst.msk [vmem:[#allocation2 + $0x64] sm:$0xf] %vm415_vm6, %v575_v58  ;;  %657 = vst [vmem:[#allocation2 + $0x68] sm:$0x1] %v656_v33  ;;  %v5473_v59 = vsel %vm5183_vm15, %v1318_v14, %v1319_v27  ;;  %v1330_v8 = vrot.slane %v5250_v49, 5  ;;  %v5484_v47 = vrot.slane %v1944_v30, 4 }
  0xf2   : > { %v3739_v9 = vcombine.low %v5460_v48, %v5473_v59  ;;  %v1333_v26 = vrot.slane %v5258_v63, 5  ;;  %v357_v27 = vsel %vm5029_vm3, 0, %v356_v46  ;;  %v662_v10 = vshrl.u32 %v3688_v38, 16  ;;  %v1286_v49 = vld [vmem:[#allocation2 + $0x48] sm:$0xe] }
  0xf3   : > { %v5491_v22 = vsel %vm5183_vm15, %v3733_v29, %v1330_v8  ;;  %v1332_v13 = vrot.slane %v1330_v8, 4  ;;  %358 = vst [vmem:[#allocation2 + $0x6c] sm:$0x1] %v357_v27  ;;  %v665_v24 = vshll.u32 %v3688_v38, 16  ;;  %v670_v32 = vshrl.u32 %v3689_v36, 16 }
  0xf4   : > { %v664_v53 = vrot.slane %v662_v10, 7  ;;  %v673_v12 = vshll.u32 %v3689_v36, 16  ;;  %v3734_v16 = vrot.slane %v1284_v4, 9  ;;  %v1337_v62 = vrot.slane %v5279_v37, 5  ;;  %v1285_v36 = vld [vmem:[#allocation2 + $0x3c] sm:$0xe] }
  0xf5   : > { %v5495_v52 = vsel %vm5183_vm15, %v1332_v13, %v1333_v26  ;;  %v5497_v63 = vrot.slane %v670_v32, 7  ;;  %v1340_v17 = vrot.slane %v5283_v56, 5  ;;  %v4547_v56 = vld [vmem:[#allocation8 + $0x50] sm:$0xff]   ;;  %v3714_v26 = vcombine.low %v5274_v19, %v5279_v37  ;;  %v4548_v13 = vld [vmem:[#allocation2 + $0x18] sm:$0xff]  }
  0xf6   : > { %v668_v30 = vrot.slane %v664_v53, 4  ;;  %v667_v33 = vor.u32 %v665_v24, %v664_v53  ;;  %v5522_v46 = vsel %vm5183_vm15, %v3734_v16, %v1337_v62  ;;  %v1339_v38 = vrot.slane %v1337_v62, 4  ;;  %v4551_v24 = vld [vmem:[#allocation8 + $0x58] sm:$0xff]   ;;  %v5555_v16 = vld [vmem:[#allocation8 + $0x60] sm:$0xff]  }
  0xf7   : > { %v2200_v43 = vld [vmem:[#allocation2 + $0x60] sm:$0xe]  ;;  %v675_v50 = vor.u32 %v673_v12, %v5497_v63  ;;  %v3735_v32 = vrot.slane %v1285_v36, 9  ;;  %v1347_v12 = vrot.slane %v5339_v35, 5  ;;  %v1309_v35 = vrot.slane %v5447_v15, 5 }
  0xf8   : > { %4124 = vmatmul.mubr.msk.bf16.vlgmr.msra.gmra.mrb[0].mxu1 %vm973_vm11, %v3711_v57  ;;  %v5509_v45 = vld [vmem:[#allocation2 + $0x64] sm:$0xf]  ;;  %v5511_v14 = vld [vmem:[#allocation2 + $0x68] sm:$0x1]  ;;  %v3805_v58 = vrot.slane %v2200_v43, 9  ;;  %v5531_v8 = vsel %vm5183_vm15, %v1339_v38, %v1340_v17  ;;  %v3716_v17 = vcombine.low %v5375_v44, %v5369_v51  ;;  %v6032_v1 = vcombine.low %v5491_v22, %v5495_v52 }
  0xf9   : > { %4140 = vmatpush3.bf16.msra.mxu1 %v5204_v20  ;;  %4127 = vmatprep.mubr.msk.bf16.mxu1 %vm973_vm11, %v3712_v3  ;;  %v2276_v57 = vrot.slane %v5509_v45, 5  ;;  %v2279_v20 = vrot.slane %v5511_v14, 5  ;;  %v676_v29 = vsel %vm5053_vm7, %v668_v30, %v675_v50  ;;  %v5557_v62 = vld [vmem:[#allocation2 + $0x18] sm:$0xe]  ;;  %v3715_v30 = vcombine.low %v5301_v18, %v5332_v55  ;;  %v4553_v36 = vld [vmem:[#allocation8 + $0xe8] sm:$0xff]  }
  0xfa   : > { %4141 = vmatprep.subr.bf16.mxu1 %v4545_v25  ;;  %v682_v3 = vld [vmem:[#allocation2 + $0x6c] sm:$0xf]  ;;  %685 = vst.msk [vmem:[#allocation2 + $0x70] sm:$0xf] %vm415_vm6, %v676_v29  ;;  %v2727_v50 = vshrl.u32 %v2702_v23, 16  ;;  %v4552_v29 = vld [vmem:[#allocation2 + $0x30] sm:$0xff]  }
  0xfb   : > { %v2277_v4 = vsel %vm5183_vm15, %v3805_v58, %v2276_v57  ;;  %v2278_v5 = vrot.slane %v2276_v57, 4  ;;  %v683_v28 = vsel %vm5062_vm8, %v667_v33, %v682_v3  ;;  %v5567_v58 = vld [vmem:[#allocation2 + $0x1c] sm:$0xf]  ;;  %v3730_v33 = vrot.slane %v1280_v39, 9  ;;  %v5647_v15 = vld [vmem:[#allocation2 + $0x40] sm:$0xf] }
  0xfc   : > { %684 = vst [vmem:[#allocation2 + $0x6c] sm:$0xf] %v683_v28  ;;  %v3736_v57 = vrot.slane %v1286_v49, 9  ;;  %v1354_v18 = vrot.slane %v5383_v7, 5  ;;  %v3732_v44 = vrot.slane %v5557_v62, 9  ;;  %v1323_v28 = vrot.slane %v5478_v6, 5 }
  0xfd   : > { %4142 = vmatpush3.bf16.msra.mxu1 %v4545_v25  ;;  %v2280_v10 = vsel %vm5183_vm15, %v2278_v5, %v2279_v20  ;;  %v1344_v25 = vrot.slane %v5332_v55, 5  ;;  %v1351_v20 = vrot.slane %v5369_v51, 5  ;;  %v3717_v55 = vcombine.low %v5413_v61, %v5415_v31  ;;  %v2705_v5 = vld [vmem:[#allocation2 + $0x24] sm:$0xf] }
  0xfe   : > { %4143 = vmatprep.subr.bf16.mxu1 %v4547_v56  ;;  %v3813_v53 = vcombine.low %v2277_v4, %v2280_v10  ;;  %v1311_v4 = vrot.slane %v1309_v35, 4  ;;  %v2730_v10 = vshll.u32 %v2702_v23, 16  ;;  %v2736_v7 = vshll.u32 %v5567_v58, 16 }
  0xff   : > { %v5551_v19 = vsel %vm5183_vm15, %v3735_v32, %v1344_v25  ;;  %v1346_v37 = vrot.slane %v1344_v25, 4  ;;  %v5579_v3 = vsel %vm5183_vm15, %v3736_v57, %v1351_v20  ;;  %v1353_v51 = vrot.slane %v1351_v20, 4  ;;  %v4557_v32 = vld [vmem:[#allocation8 + $0xf0] sm:$0xff]  }
 0x100   : > { %4128 = vmatmul.mubr.msk.bf16.gmra.mrb[4].mxu1 %vm973_vm11, %v3713_v42  ;;  %4232 = vmatmul.mubr.msk.bf16.gmra.mrb[12].mxu0 %vm973_vm11, %v3813_v53  ;;  %v4550_v42 = vld [vmem:[#allocation2 + $0x24] sm:$0xff]   ;;  %v2740_v61 = vshrl.u32 %v5567_v58, 16  ;;  %v4582_v53 = vld [vmem:[#allocation2 + $0x20] sm:$0x1]  ;;  %v2729_v6 = vrot.slane %v2727_v50, 4  ;;  %v2751_v23 = vshrl.u32 %v2705_v5, 16 }
 0x101   : > { %4131 = vmatprep.mubr.msk.bf16.mxu1 %vm973_vm11, %v3714_v26  ;;  %4243 = vmatprep.mubr.msk.bf16.mxu0 %vm973_vm11, %v4548_v13  ;;  %v5561_v43 = vsel %vm5183_vm15, %v1346_v37, %v1347_v12  ;;  %v1287_v26 = vld [vmem:[#allocation2 + $0x54] sm:$0xe]  ;;  %v5585_v13 = vld [vmem:[#allocation2 + $0x28] sm:$0xf]  ;;  %v1326_v25 = vrot.slane %v4582_v53, 5  ;;  %v5595_v39 = vsel %vm5183_vm15, %v1353_v51, %v1354_v18  ;;  %v4554_v50 = vld [vmem:[#allocation2 + $0x3c] sm:$0xff]  }
 0x102   : > { %4144 = vmatpush3.bf16.msra.mxu1 %v4547_v56  ;;  %v4581_v56 = vld [vmem:[#allocation2 + $0x8] sm:$0x1]  ;;  %v5591_v12 = vld [vmem:[#allocation2 + $0x20] sm:$0x1]  ;;  %v3737_v49 = vrot.slane %v1287_v26, 9  ;;  %v2732_v57 = vrot.slane %v2730_v10, 5 }
 0x103   : > { %4145 = vmatprep.subr.bf16.mxu1 %v4551_v24  ;;  %v1312_v38 = vrot.slane %v4581_v56, 5  ;;  %v5606_v20 = vrot.slane %v2736_v7, 5  ;;  %v2742_v56 = vrot.slane %v2740_v61, 4  ;;  %v5609_v18 = vld [vmem:[#allocation2 + $0x2c] sm:$0x1]  ;;  %v2753_v53 = vrot.slane %v2751_v23, 4 }
 0x104   : > { %v2708_v51 = vld [vmem:[#allocation2 + $0x30] sm:$0xf]  ;;  %v5616_v10 = vld [vmem:[#allocation2 + $0x34] sm:$0xf] }
 0x105   : > { %v1313_v37 = vsel %vm5183_vm15, %v1311_v4, %v1312_v38  ;;  %v1361_v38 = vrot.slane %v5423_v11, 5  ;;  %v1325_v4 = vrot.slane %v1323_v28, 4  ;;  %v4561_v7 = vld [vmem:[#allocation8 + $0xf8] sm:$0xff]  }
 0x106   : > { %4146 = vmatpush3.bf16.msra.mxu1 %v4551_v24  ;;  %v1310_v24 = vsel %vm5183_vm15, %v3730_v33, %v1309_v35  ;;  %v1358_v33 = vrot.slane %v5415_v31, 5  ;;  %v2746_v31 = vshll.u32 %v5591_v12, 16 }
 0x107   : > { %4163 = vmatprep.subr.bf16.mxu1 %v5555_v16 }
 0x108   : > { %4132 = vmatmul.mubr.msk.bf16.gmra.mrb[8].mxu1 %vm973_vm11, %v3715_v30  ;;  %4244 = vmatmul.mubr.msk.bf16.vlgmr.msra.gmra.mrb[0].mxu0 %vm973_vm11, %v4550_v42  ;;  %v2754_v42 = vshll.u32 %v2705_v5, 16  ;;  %v2760_v30 = vshll.u32 %v5585_v13, 16  ;;  %v5613_v5 = vsel %vm5183_vm15, %v3737_v49, %v1358_v33  ;;  %v1360_v26 = vrot.slane %v1358_v33, 4 }
 0x109   : > { %4135 = vmatprep.mubr.msk.bf16.mxu1 %vm973_vm11, %v3716_v17  ;;  %4260 = vmatpush3.bf16.msra.mxu0 %v5397_v21  ;;  %v2764_v17 = vshrl.u32 %v5585_v13, 16  ;;  %v4556_v21 = vld [vmem:[#allocation2 + $0x48] sm:$0xff]   ;;  %v2733_v49 = vor.u32 %v2732_v57, %v2729_v6  ;;  %v2788_v33 = vshrl.u32 %v5616_v10, 16  ;;  %v5637_v6 = vld [vmem:[#allocation8 + $0x100] sm:$0xff]  }
 0x10a   : > { %4247 = vmatprep.mubr.msk.bf16.mxu0 %vm973_vm11, %v4552_v29  ;;  %4261 = vmatprep.subr.bf16.mxu0 %v4553_v36  ;;  %v3738_v29 = vcombine.low %v1310_v24, %v1313_v37  ;;  %v2756_v61 = vrot.slane %v2754_v42, 5  ;;  %v5618_v11 = vrot.slane %v2760_v30, 5  ;;  %v5622_v37 = vsel %vm5183_vm15, %v1360_v26, %v1361_v38  ;;  %v4558_v57 = vld [vmem:[#allocation2 + $0x54] sm:$0xff]  }
 0x10b   : > { %v2766_v24 = vrot.slane %v2764_v17, 4  ;;  %v2775_v42 = vshrl.u32 %v2708_v51, 16  ;;  %v2778_v30 = vshll.u32 %v2708_v51, 16  ;;  %v2784_v17 = vshll.u32 %v5616_v10, 16 }
 0x10c   : > { %v2748_v38 = vrot.slane %v2746_v31, 5  ;;  %v2734_v62 = vrot.slane %v2733_v49, 4  ;;  %v2790_v35 = vrot.slane %v2788_v33, 4  ;;  %v2714_v31 = vld [vmem:[#allocation2 + $0x48] sm:$0xf] }
 0x10d   : > { %4262 = vmatpush3.bf16.msra.mxu0 %v4553_v36  ;;  %v2743_v36 = vor.u32 %v2742_v56, %v5606_v20  ;;  %v1327_v56 = vsel %vm5183_vm15, %v1325_v4, %v1326_v25  ;;  %v2767_v51 = vor.u32 %v2766_v24, %v5618_v11  ;;  %v5645_v23 = vrot.slane %v2784_v17, 5  ;;  %v4560_v25 = vld [vmem:[#allocation2 + $0x60] sm:$0xff]   ;;  %v4563_v33 = vld [vmem:[#allocation8 + $0x70] sm:$0xff]  }
 0x10e   : > { %4263 = vmatprep.subr.bf16.mxu0 %v4557_v32  ;;  %v2812_v17 = vshrl.u32 %v5647_v15, 16 }
 0x10f   : > { %v2744_v26 = vrot.slane %v2743_v36, 4  ;;  %v2768_v24 = vrot.slane %v2767_v51, 4  ;;  %v2799_v36 = vshrl.u32 %v2711_v54, 16  ;;  %v2791_v59 = vor.u32 %v2790_v35, %v5645_v23  ;;  %v2717_v51 = vld [vmem:[#allocation2 + $0x54] sm:$0xf] }
 0x110   : > { %4136 = vmatmul.mubr.msk.bf16.gmra.mrb[12].mxu1 %vm973_vm11, %v3717_v55  ;;  %4248 = vmatmul.mubr.msk.bf16.gmra.mrb[4].mxu0 %vm973_vm11, %v4554_v50  ;;  %v1324_v55 = vsel %vm5183_vm15, %v3732_v44, %v1323_v28  ;;  %v2770_v50 = vshll.u32 %v5609_v18, 16  ;;  %v2777_v44 = vrot.slane %v2775_v42, 4  ;;  %v2780_v28 = vrot.slane %v2778_v30, 5 }
 0x111   : > { %4147 = vmatprep.mubr.msk.bf16.mxu1 %vm973_vm11, %v3738_v29  ;;  %4251 = vmatprep.mubr.msk.bf16.mxu0 %vm973_vm11, %v4556_v21  ;;  %v2757_v29 = vor.u32 %v2756_v61, %v2753_v53  ;;  %v5643_v21 = vld [vmem:[#allocation2 + $0x38] sm:$0x1]  ;;  %v3740_v27 = vcombine.low %v1324_v55, %v1327_v56  ;;  %v5649_v53 = vld [vmem:[#allocation2 + $0x4c] sm:$0xf]  ;;  %v2802_v42 = vshll.u32 %v2711_v54, 16  ;;  %v2808_v30 = vshll.u32 %v5647_v15, 16 }
 0x112   : > { %4264 = vmatpush3.bf16.msra.mxu0 %v4557_v32  ;;  %v4559_v32 = vld [vmem:[#allocation8 + $0x68] sm:$0xff]   ;;  %v2772_v4 = vrot.slane %v2770_v50, 5  ;;  %v2794_v49 = vshll.u32 %v5643_v21, 16  ;;  %v2749_v55 = vsel %vm5109_vm12, %v2744_v26, %v2748_v38  ;;  %v2781_v48 = vor.u32 %v2780_v28, %v2777_v44 }
 0x113   : > { %4265 = vmatprep.subr.bf16.mxu0 %v4561_v7  ;;  %v2758_v61 = vrot.slane %v2757_v29, 4  ;;  %v2823_v54 = vshrl.u32 %v2714_v31, 16  ;;  %v2832_v50 = vshll.u32 %v5649_v53, 16  ;;  %v2836_v56 = vshrl.u32 %v5649_v53, 16  ;;  %v5676_v29 = vld [vmem:[#allocation2 + $0x44] sm:$0x1] }
 0x114   : > { %v2773_v35 = vsel %vm5109_vm12, %v2768_v24, %v2772_v4  ;;  %v2796_v38 = vrot.slane %v2794_v49, 5  ;;  %v5678_v26 = vrot.slane %v2808_v30, 5  ;;  %v2814_v44 = vrot.slane %v2812_v17, 4  ;;  %v4565_v30 = vld [vmem:[#allocation8 + $0x78] sm:$0xff]  }
 0x115   : > { %v2792_v40 = vrot.slane %v2791_v59, 4  ;;  %v2825_v4 = vrot.slane %v2823_v54, 4  ;;  %v5684_v24 = vrot.slane %v2832_v50, 5  ;;  %v2838_v49 = vrot.slane %v2836_v56, 4  ;;  %v5687_v17 = vld [vmem:[#allocation2 + $0x50] sm:$0x1] }
 0x116   : > { %4266 = vmatpush3.bf16.msra.mxu0 %v4561_v7  ;;  %v2739_v7 = vsel %vm5109_vm12, %v2734_v62, %v5606_v20  ;;  %v2826_v20 = vshll.u32 %v2714_v31, 16  ;;  %v2804_v62 = vrot.slane %v2802_v42, 5  ;;  %v2782_v31 = vrot.slane %v2781_v48, 4  ;;  %v2720_v59 = vld [vmem:[#allocation2 + $0x60] sm:$0xf] }
 0x117   : > { %4283 = vmatprep.subr.bf16.mxu0 %v5637_v6  ;;  %v2847_v48 = vshrl.u32 %v2717_v51, 16  ;;  %v2850_v52 = vshll.u32 %v2717_v51, 16  ;;  %v2797_v50 = vsel %vm5109_vm12, %v2792_v40, %v2796_v38 }
 0x118   : > { %4148 = vmatmul.mubr.msk.bf16.vlgmr.msra.gmra.mrb[0].mxu1 %vm973_vm11, %v3739_v9  ;;  %4252 = vmatmul.mubr.msk.bf16.gmra.mrb[8].mxu0 %vm973_vm11, %v4558_v57  ;;  %v388_v9 = vld [vmem:[#allocation2 + $0x74] sm:$0x1]  ;;  %v2763_v57 = vsel %vm5109_vm12, %v2758_v61, %v5618_v11  ;;  %v5682_v11 = vld [vmem:[#allocation2 + $0x58] sm:$0xf]  ;;  %v2828_v61 = vrot.slane %v2826_v20, 5  ;;  %v2787_v22 = vsel %vm5109_vm12, %v2782_v31, %v5645_v23  ;;  %v2871_v23 = vshrl.u32 %v2720_v59, 16 }
 0x119   : > { %4164 = vmatpush3.bf16.msra.mxu1 %v5555_v16  ;;  %4151 = vmatprep.mubr.msk.bf16.mxu1 %vm973_vm11, %v3740_v27  ;;  %v4562_v16 = vld [vmem:[#allocation2 + $0x6c] sm:$0xff]   ;;  %v2801_v27 = vrot.slane %v2799_v36, 4  ;;  %v389_v28 = vsel %vm5034_vm4, 0, %v388_v9  ;;  %v677_v36 = vrot.slane %v5497_v63, 4  ;;  %v3847_v42 = vcombine.low %v2763_v57, %v2773_v35  ;;  %v5695_v9 = vld [vmem:[#allocation2 + $0x64] sm:$0xf] }
 0x11a   : > { %4165 = vmatprep.subr.bf16.mxu1 %v4559_v32  ;;  %4255 = vmatprep.mubr.msk.bf16.mxu0 %vm973_vm11, %v4560_v25  ;;  %v3846_v25 = vcombine.low %v2739_v7, %v2749_v55  ;;  %390 = vst [vmem:[#allocation2 + $0x74] sm:$0x1] %v389_v28  ;;  %v2815_v7 = vor.u32 %v2814_v44, %v5678_v26  ;;  %v2818_v55 = vshll.u32 %v5676_v29, 16  ;;  %v2856_v54 = vshll.u32 %v5682_v11, 16 }
 0x11b   : > { %v6033_v63 = vcombine.low %v5522_v46, %v5531_v8  ;;  %v2860_v20 = vshrl.u32 %v5682_v11, 16  ;;  %v2829_v56 = vor.u32 %v2828_v61, %v2825_v4  ;;  %v2839_v46 = vor.u32 %v2838_v49, %v5684_v24  ;;  %v2723_v4 = vld [vmem:[#allocation2 + $0x6c] sm:$0xf] }
 0x11c   : > { %v2842_v8 = vshll.u32 %v5687_v17, 16  ;;  %v2874_v57 = vshll.u32 %v2720_v59, 16  ;;  %v2880_v35 = vshll.u32 %v5695_v9, 16  ;;  %v2849_v44 = vrot.slane %v2847_v48, 4 }
 0x11d   : > { %4166 = vmatpush3.bf16.msra.mxu1 %v4559_v32  ;;  %v2805_v32 = vor.u32 %v2804_v62, %v2801_v27  ;;  %v2884_v27 = vshrl.u32 %v5695_v9, 16  ;;  %v2816_v62 = vrot.slane %v2815_v7, 4  ;;  %v2852_v40 = vrot.slane %v2850_v52, 5  ;;  %v5722_v7 = vld [vmem:[#allocation8 + $0x80] sm:$0xff]  }
 0x11e   : > { %4167 = vmatprep.subr.bf16.mxu1 %v4563_v33  ;;  %v5716_v38 = vrot.slane %v2856_v54, 5  ;;  %v3848_v61 = vcombine.low %v2787_v22, %v2797_v50  ;;  %v2830_v49 = vrot.slane %v2829_v56, 4  ;;  %v2844_v59 = vrot.slane %v2842_v8, 5  ;;  %v5735_v54 = vld [vmem:[#allocation2 + $0x68] sm:$0x1] }
 0x11f   : > { %v2806_v51 = vrot.slane %v2805_v32, 4  ;;  %v4566_v32 = vld [vmem:[#allocation8 + $0x108] sm:$0xff]   ;;  %v2876_v48 = vrot.slane %v2874_v57, 5  ;;  %v5725_v52 = vrot.slane %v2880_v35, 5  ;;  %v2886_v0 = vrot.slane %v2884_v27, 4  ;;  %v4568_v8 = vld [vmem:[#allocation8 + $0x110] sm:$0xff]  }
 0x120   : > { %4152 = vmatmul.mubr.msk.bf16.gmra.mrb[4].mxu1 %vm973_vm11, %v6032_v1  ;;  %4256 = vmatmul.mubr.msk.bf16.gmra.mrb[12].mxu0 %vm973_vm11, %v4562_v16  ;;  %v5712_v16 = vld [vmem:[#allocation2 + $0x5c] sm:$0x1]  ;;  %v2840_v1 = vrot.slane %v2839_v46, 4  ;;  %v2898_v50 = vshll.u32 %v2723_v4, 16  ;;  %v6035_v56 = vcombine.low %v5579_v3, %v5595_v39  ;;  %v2890_v35 = vshll.u32 %v5735_v54, 16 }
 0x121   : > { %4155 = vmatprep.mubr.msk.bf16.mxu1 %vm973_vm11, %v6033_v63  ;;  %4267 = vmatprep.mubr.msk.bf16.mxu0 %vm973_vm11, %v3846_v25  ;;  %v686_v28 = vld [vmem:[#allocation2 + $0x74] sm:$0x1]  ;;  %v2862_v25 = vrot.slane %v2860_v20, 4  ;;  %v5720_v63 = vld [vmem:[#allocation2 + $0x70] sm:$0xf]  ;;  %v2866_v22 = vshll.u32 %v5712_v16, 16  ;;  %v2887_v57 = vor.u32 %v2886_v0, %v5725_v52 }
 0x122   : > { %4168 = vmatpush3.bf16.msra.mxu1 %v4563_v33  ;;  %v2820_v33 = vrot.slane %v2818_v55, 5  ;;  %v687_v31 = vsel %vm5029_vm3, %v677_v36, %v686_v28  ;;  %v2873_v55 = vrot.slane %v2871_v23, 4  ;;  %v6034_v36 = vcombine.low %v5551_v19, %v5561_v43  ;;  %v1798_v27 = vld [vmem:[#allocation2 + $0x48] sm:$0xf]  ;;  %v4571_v0 = vld [vmem:[#allocation8 + $0x118] sm:$0xff]  }
 0x123   : > { %4169 = vmatprep.subr.bf16.mxu1 %v4565_v30  ;;  %688 = vst [vmem:[#allocation2 + $0x74] sm:$0x1] %v687_v31  ;;  %v2895_v20 = vshrl.u32 %v2723_v4, 16  ;;  %v2853_v43 = vor.u32 %v2852_v40, %v2849_v44  ;;  %v2863_v46 = vor.u32 %v2862_v25, %v5716_v38  ;;  %v2845_v3 = vsel %vm5109_vm12, %v2840_v1, %v2844_v59  ;;  %v4567_v44 = vld [vmem:[#allocation2 + $0xc] sm:$0xff]   ;;  %v3112_v4 = vld [vmem:[#allocation2 + $0x18] sm:$0xe] }
 0x124   : > { %v2821_v19 = vsel %vm5109_vm12, %v2816_v62, %v2820_v33  ;;  %v2908_v39 = vshrl.u32 %v5720_v63, 16  ;;  %v2877_v23 = vor.u32 %v2876_v48, %v2873_v55  ;;  %v2900_v33 = vrot.slane %v2898_v50, 5 }
 0x125   : > { %v2897_v62 = vrot.slane %v2895_v20, 4  ;;  %v2864_v40 = vrot.slane %v2863_v46, 4  ;;  %v1931_v1 = vshll.u32 %v1798_v27, 16  ;;  %v2888_v55 = vrot.slane %v2887_v57, 4  ;;  %v5776_v46 = vld [vmem:[#allocation2 + $0x24] sm:$0xe] }
 0x126   : > { %4170 = vmatpush3.bf16.msra.mxu1 %v4565_v30  ;;  %v2811_v30 = vsel %vm5109_vm12, %v2806_v51, %v5678_v26  ;;  %v2904_v26 = vshll.u32 %v5720_v63, 16  ;;  %v2868_v51 = vrot.slane %v2866_v22, 5  ;;  %v2910_v31 = vrot.slane %v2908_v39, 4  ;;  %v4569_v39 = vld [vmem:[#allocation2 + $0x18] sm:$0xff]   ;;  %v3114_v57 = vld [vmem:[#allocation2 + $0x30] sm:$0xe] }
 0x127   : > { %4307 = vmatprep.subr.bf16.mxu1 %v5722_v7  ;;  %v2878_v59 = vrot.slane %v2877_v23, 4  ;;  %v2892_v48 = vrot.slane %v2890_v35, 5  ;;  %v2901_v22 = vor.u32 %v2900_v33, %v2897_v62  ;;  %v1933_v20 = vrot.slane %v1931_v1, 5 }
 0x128   : > { %4156 = vmatmul.mubr.msk.bf16.gmra.mrb[8].mxu1 %vm973_vm11, %v6034_v36  ;;  %4268 = vmatmul.mubr.msk.bf16.vlgmr.msra.gmra.mrb[0].mxu0 %vm973_vm11, %v3847_v42  ;;  %v2835_v42 = vsel %vm5109_vm12, %v2830_v49, %v5684_v24  ;;  %v2854_v24 = vrot.slane %v2853_v43, 4  ;;  %v5756_v25 = vrot.slane %v2904_v26, 5  ;;  %v1928_v49 = vshrl.u32 %v1798_v27, 16 }
 0x129   : > { %4159 = vmatprep.mubr.msk.bf16.mxu1 %vm973_vm11, %v6035_v56  ;;  %4284 = vmatpush3.bf16.msra.mxu0 %v5637_v6  ;;  %v3849_v6 = vcombine.low %v2811_v30, %v2821_v19  ;;  %v3850_v28 = vcombine.low %v2835_v42, %v2845_v3  ;;  %v6036_v30 = vcombine.low %v5613_v5, %v5622_v37  ;;  %v3866_v56 = vrot.slane %v3112_v4, 9 }
 0x12a   : > { %4271 = vmatprep.mubr.msk.bf16.mxu0 %vm973_vm11, %v3848_v61  ;;  %4285 = vmatprep.subr.bf16.mxu0 %v4566_v32  ;;  %v3146_v61 = vrot.slane %v5567_v58, 5  ;;  %v5759_v36 = vld [vmem:[#allocation2 + $0x74] sm:$0x1]  ;;  %v2859_v58 = vsel %vm5109_vm12, %v2854_v24, %v5716_v38  ;;  %v2869_v50 = vsel %vm5109_vm12, %v2864_v40, %v2868_v51  ;;  %v2911_v5 = vor.u32 %v2910_v31, %v5756_v25  ;;  %v4570_v51 = vld [vmem:[#allocation2 + $0x24] sm:$0xff]  }
 0x12b   : > { %v2914_v37 = vshll.u32 %v5759_v36, 16  ;;  %v3149_v43 = vrot.slane %v5591_v12, 5  ;;  %v2883_v38 = vsel %vm5109_vm12, %v2878_v59, %v5725_v52  ;;  %v2893_v26 = vsel %vm5109_vm12, %v2888_v55, %v2892_v48  ;;  %v1795_v52 = vld [vmem:[#allocation2 + $0x3c] sm:$0xf] }
 0x12c   : > { %v3148_v19 = vrot.slane %v3146_v61, 4  ;;  %v3153_v42 = vrot.slane %v5585_v13, 5  ;;  %v2902_v23 = vrot.slane %v2901_v22, 4  ;;  %v5786_v12 = vsel %vm5183_vm15, %v3866_v56, %v3146_v61 }
 0x12d   : > { %4286 = vmatpush3.bf16.msra.mxu0 %v4566_v32  ;;  %v1930_v32 = vrot.slane %v1928_v49, 4  ;;  %v3867_v35 = vrot.slane %v5776_v46, 9  ;;  %v3156_v27 = vrot.slane %v5609_v18, 5  ;;  %v3852_v62 = vcombine.low %v2883_v38, %v2893_v26  ;;  %v4573_v46 = vld [vmem:[#allocation2 + $0x3c] sm:$0xff]  }
 0x12e   : > { %4287 = vmatprep.subr.bf16.mxu0 %v4568_v8  ;;  %v2912_v33 = vrot.slane %v2911_v5, 4  ;;  %v5792_v13 = vsel %vm5183_vm15, %v3148_v19, %v3149_v43  ;;  %v3155_v24 = vrot.slane %v3153_v42, 4  ;;  %v3868_v40 = vrot.slane %v3114_v57, 9 }
 0x12f   : > { %v1934_v3 = vor.u32 %v1933_v20, %v1930_v32  ;;  %v3160_v31 = vrot.slane %v5616_v10, 5  ;;  %v2907_v4 = vsel %vm5109_vm12, %v2902_v23, %v5756_v25  ;;  %v1904_v61 = vshrl.u32 %v1795_v52, 16  ;;  %v4585_v25 = vld [vmem:[#allocation8 + $0x88] sm:$0xff]  }
 0x130   : > { %4160 = vmatmul.mubr.msk.bf16.gmra.mrb[12].mxu1 %vm973_vm11, %v6036_v30  ;;  %4272 = vmatmul.mubr.msk.bf16.gmra.mrb[4].mxu0 %vm973_vm11, %v3849_v6  ;;  %v1907_v49 = vshll.u32 %v1795_v52, 16  ;;  %v6037_v1 = vsel %vm5109_vm12, %v5484_v47, %v5476_v34  ;;  %v1985_v34 = vshll.u32 %v5509_v45, 16  ;;  %v1989_v47 = vshrl.u32 %v5509_v45, 16 }
 0x131   : > { %4171 = vmatprep.mubr.msk.bf16.mxu1 %vm973_vm11, %v4567_v44  ;;  %4275 = vmatprep.mubr.msk.bf16.mxu0 %vm973_vm11, %v3850_v28  ;;  %v1935_v6 = vrot.slane %v1934_v3, 4  ;;  %v2916_v44 = vrot.slane %v2914_v37, 5  ;;  %v1804_v28 = vld [vmem:[#allocation2 + $0x60] sm:$0xf]  ;;  %v3162_v22 = vrot.slane %v3160_v31, 4  ;;  %v3163_v32 = vrot.slane %v5643_v21, 5 }
 0x132   : > { %4288 = vmatpush3.bf16.msra.mxu0 %v4568_v8  ;;  %v3851_v8 = vcombine.low %v2859_v58, %v2869_v50  ;;  %v1976_v48 = vshrl.u32 %v1804_v28, 16  ;;  %v4572_v50 = vld [vmem:[#allocation2 + $0x30] sm:$0xff]   ;;  %v1906_v56 = vrot.slane %v1904_v61, 4  ;;  %v1909_v5 = vrot.slane %v1907_v49, 5 }
 0x133   : > { %4289 = vmatprep.subr.bf16.mxu0 %v4571_v0  ;;  %v1940_v18 = vsel %vm5109_vm12, %v1935_v6, %v5406_v60  ;;  %v4584_v60 = vld [vmem:[#allocation2 + $0x40] sm:$0xf]  ;;  %v2917_v30 = vsel %vm5109_vm12, %v2912_v33, %v2916_v44  ;;  %v1987_v37 = vrot.slane %v1985_v34, 5  ;;  %v1991_v19 = vrot.slane %v1989_v47, 4  ;;  %v4575_v34 = vld [vmem:[#allocation2 + $0x54] sm:$0xff]  }
 0x134   : > { %v5807_v59 = vcombine.low %v1940_v18, %v6037_v1  ;;  %v1913_v10 = vshll.u32 %v4584_v60, 16  ;;  %v1917_v55 = vshrl.u32 %v4584_v60, 16  ;;  %v1978_v20 = vrot.slane %v1976_v48, 4  ;;  %v4589_v1 = vld [vmem:[#allocation8 + $0x98] sm:$0xff]  }
 0x135   : > { %v3853_v43 = vcombine.low %v2907_v4, %v2917_v30  ;;  %v3874_v3 = vcombine.low %v5786_v12, %v5792_v13  ;;  %v3154_v21 = vsel %vm5183_vm15, %v3867_v35, %v3153_v42  ;;  %v3157_v57 = vsel %vm5183_vm15, %v3155_v24, %v3156_v27  ;;  %v4587_v42 = vld [vmem:[#allocation2 + $0x44] sm:$0x1]  ;;  %v3116_v13 = vld [vmem:[#allocation2 + $0x48] sm:$0xe] }
 0x136   : > { %4290 = vmatpush3.bf16.msra.mxu0 %v4571_v0  ;;  %v1979_v0 = vshll.u32 %v1804_v28, 16  ;;  %v5819_v38 = vrot.slane %v1913_v10, 5  ;;  %v1919_v45 = vrot.slane %v1917_v55, 4  ;;  %v3161_v52 = vsel %vm5183_vm15, %v3868_v40, %v3160_v31  ;;  %v4588_v31 = vld [vmem:[#allocation2 + $0x58] sm:$0xf]  ;;  %v4574_v55 = vld [vmem:[#allocation2 + $0x48] sm:$0xff]  }
 0x137   : > { %v3167_v6 = vrot.slane %v5647_v15, 5  ;;  %v3164_v12 = vsel %vm5183_vm15, %v3162_v22, %v3163_v32  ;;  %v1910_v33 = vor.u32 %v1909_v5, %v1906_v56  ;;  %v1923_v35 = vshll.u32 %v4587_v42, 16 }
 0x138   : > { %4172 = vmatmul.mubr.msk.bf16.vlgmr.msra.gmra.mrb[0].mxu1 %vm973_vm11, %v4569_v39  ;;  %4276 = vmatmul.mubr.msk.bf16.gmra.mrb[8].mxu0 %vm973_vm11, %v3851_v8  ;;  %v1981_v58 = vrot.slane %v1979_v0, 5  ;;  %v1801_v39 = vld [vmem:[#allocation2 + $0x54] sm:$0xf]  ;;  %v1992_v8 = vor.u32 %v1991_v19, %v1987_v37  ;;  %v1920_v27 = vor.u32 %v1919_v45, %v5819_v38  ;;  %v3174_v15 = vrot.slane %v5649_v53, 5 }
 0x139   : > { %4311 = vmatpush3.bf16.msra.mxu1 %v5722_v7  ;;  %4175 = vmatprep.mubr.msk.bf16.mxu1 %vm973_vm11, %v4570_v51  ;;  %v1995_v7 = vshll.u32 %v5511_v14, 16  ;;  %v4586_v14 = vld [vmem:[#allocation8 + $0x90] sm:$0xff]   ;;  %v1952_v28 = vshrl.u32 %v1801_v39, 16  ;;  %v1955_v40 = vshll.u32 %v1801_v39, 16  ;;  %v1961_v18 = vshll.u32 %v4588_v31, 16  ;;  %v4576_v39 = vld [vmem:[#allocation2 + $0x60] sm:$0xff]  }
 0x13a   : > { %4308 = vmatprep.subr.bf16.mxu1 %v4585_v25  ;;  %4279 = vmatprep.mubr.msk.bf16.mxu0 %vm973_vm11, %v3852_v62  ;;  %v1982_v26 = vor.u32 %v1981_v58, %v1978_v20  ;;  %v3115_v62 = vld [vmem:[#allocation2 + $0x3c] sm:$0xe]  ;;  %v1993_v44 = vrot.slane %v1992_v8, 4  ;;  %v1965_v4 = vshrl.u32 %v4588_v31, 16  ;;  %v3875_v49 = vcombine.low %v3154_v21, %v3157_v57  ;;  %v3117_v45 = vld [vmem:[#allocation2 + $0x54] sm:$0xe] }
 0x13b   : > { %v1997_v23 = vrot.slane %v1995_v7, 5  ;;  %v3869_v60 = vrot.slane %v3115_v62, 9  ;;  %v3170_v53 = vrot.slane %v5676_v29, 5  ;;  %v3876_v48 = vcombine.low %v3161_v52, %v3164_v12 }
 0x13c   : > { %v1983_v51 = vrot.slane %v1982_v26, 4  ;;  %v3169_v0 = vrot.slane %v3167_v6, 4  ;;  %v3870_v30 = vrot.slane %v3116_v13, 9  ;;  %v1911_v47 = vrot.slane %v1910_v33, 4 }
 0x13d   : > { %4312 = vmatpush3.bf16.msra.mxu1 %v4585_v25  ;;  %v1998_v61 = vsel %vm5109_vm12, %v1993_v44, %v1997_v23  ;;  %v1925_v25 = vrot.slane %v1923_v35, 5  ;;  %v1921_v7 = vrot.slane %v1920_v27, 4  ;;  %v3176_v22 = vrot.slane %v3174_v15, 4  ;;  %v3118_v23 = vld [vmem:[#allocation2 + $0x60] sm:$0xe] }
 0x13e   : > { %4309 = vmatprep.subr.bf16.mxu1 %v4586_v14  ;;  %v1988_v24 = vsel %vm5109_vm12, %v1983_v51, %v1987_v37  ;;  %v3177_v32 = vrot.slane %v5687_v17, 5  ;;  %v1954_v20 = vrot.slane %v1952_v28, 4  ;;  %v1957_v58 = vrot.slane %v1955_v40, 5 }
 0x13f   : > { %v5843_v10 = vcombine.low %v1988_v24, %v1998_v61  ;;  %v1967_v56 = vrot.slane %v1965_v4, 4  ;;  %v3168_v29 = vsel %vm5183_vm15, %v3869_v60, %v3167_v6  ;;  %v3171_v5 = vsel %vm5183_vm15, %v3169_v0, %v3170_v53  ;;  %v3119_v24 = vld [vmem:[#allocation2 + $0x6c] sm:$0xe] }
 0x140   : > { %4176 = vmatmul.mubr.msk.bf16.gmra.mrb[4].mxu1 %vm973_vm11, %v4572_v50  ;;  %4280 = vmatmul.mubr.msk.bf16.gmra.mrb[12].mxu0 %vm973_vm11, %v3853_v43  ;;  %v1963_v50 = vrot.slane %v1961_v18, 5  ;;  %v1916_v17 = vsel %vm5109_vm12, %v1911_v47, %v5819_v38  ;;  %v3175_v37 = vsel %vm5183_vm15, %v3870_v30, %v3174_v15  ;;  %v3178_v19 = vsel %vm5183_vm15, %v3176_v22, %v3177_v32 }
 0x141   : > { %4179 = vmatprep.mubr.msk.bf16.mxu1 %vm973_vm11, %v4573_v46  ;;  %4291 = vmatprep.mubr.msk.bf16.mxu0 %vm973_vm11, %v3874_v3  ;;  %v3181_v43 = vrot.slane %v5682_v11, 5  ;;  %v1926_v46 = vsel %vm5109_vm12, %v1921_v7, %v1925_v25  ;;  %v1958_v26 = vor.u32 %v1957_v58, %v1954_v20  ;;  %v4590_v3 = vld [vmem:[#allocation2 + $0x5c] sm:$0x1]  ;;  %v3188_v38 = vrot.slane %v5695_v9, 5 }
 0x142   : > { %4313 = vmatpush3.bf16.msra.mxu1 %v4586_v14  ;;  %v1968_v14 = vor.u32 %v1967_v56, %v1963_v50  ;;  %v1971_v21 = vshll.u32 %v4590_v3, 16  ;;  %v3877_v8 = vcombine.low %v3168_v29, %v3171_v5  ;;  %v3782_v57 = vcombine.low %v1916_v17, %v1926_v46 }
 0x143   : > { %4310 = vmatprep.subr.bf16.mxu1 %v4589_v1  ;;  %v3878_v52 = vcombine.low %v3175_v37, %v3178_v19  ;;  %v3871_v6 = vrot.slane %v3117_v45, 9  ;;  %v3184_v11 = vrot.slane %v5712_v16, 5  ;;  %v3183_v51 = vrot.slane %v3181_v43, 4 }
 0x144   : > { %v1959_v12 = vrot.slane %v1958_v26, 4  ;;  %v1969_v62 = vrot.slane %v1968_v14, 4  ;;  %v1973_v33 = vrot.slane %v1971_v21, 5  ;;  %v3872_v42 = vrot.slane %v3118_v23, 9 }
 0x145   : > { %v3190_v35 = vrot.slane %v3188_v38, 4  ;;  %v3191_v44 = vrot.slane %v5735_v54, 5  ;;  %v3182_v9 = vsel %vm5183_vm15, %v3871_v6, %v3181_v43  ;;  %v3185_v16 = vsel %vm5183_vm15, %v3183_v51, %v3184_v11 }
 0x146   : > { %4314 = vmatpush3.bf16.msra.mxu1 %v4589_v1  ;;  %v1964_v27 = vsel %vm5109_vm12, %v1959_v12, %v1963_v50  ;;  %v1974_v54 = vsel %vm5109_vm12, %v1969_v62, %v1973_v33  ;;  %v3195_v13 = vrot.slane %v5720_v63, 5  ;;  %v3189_v15 = vsel %vm5183_vm15, %v3872_v42, %v3188_v38 }
 0x147   : > { %v3192_v28 = vsel %vm5183_vm15, %v3190_v35, %v3191_v44  ;;  %v3879_v40 = vcombine.low %v3182_v9, %v3185_v16  ;;  %v3784_v31 = vcombine.low %v1964_v27, %v1974_v54  ;;  %v3873_v4 = vrot.slane %v3119_v24, 9 }
 0x148   : > { %4180 = vmatmul.mubr.msk.bf16.gmra.mrb[8].mxu1 %vm973_vm11, %v4574_v55  ;;  %4292 = vmatmul.mubr.msk.bf16.vlgmr.msra.gmra.mrb[0].mxu0 %vm973_vm11, %v3875_v49  ;;  %v3880_v18 = vcombine.low %v3189_v15, %v3192_v28  ;;  %v3197_v61 = vrot.slane %v3195_v13, 4  ;;  %v3198_v49 = vrot.slane %v5759_v36, 5 }
 0x149   : > { %4183 = vmatprep.mubr.msk.bf16.mxu1 %vm973_vm11, %v4575_v34  ;;  %4295 = vmatprep.mubr.msk.bf16.mxu0 %vm973_vm11, %v3876_v48  ;;  %v3196_v41 = vsel %vm5183_vm15, %v3873_v4, %v3195_v13 }
 0x14a   : > { %v3199_v63 = vsel %vm5183_vm15, %v3197_v61, %v3198_v49 }
 0x14b   : > { %v3881_v1 = vcombine.low %v3196_v41, %v3199_v63 }
 0x150   : > { %4184 = vmatmul.mubr.msk.bf16.gmra.mrb[12].mxu1 %vm973_vm11, %v4576_v39  ;;  %4296 = vmatmul.mubr.msk.bf16.gmra.mrb[4].mxu0 %vm973_vm11, %v3877_v8 }
 0x151   : > { %4203 = vmatprep.mubr.msk.bf16.mxu1 %vm973_vm11, %v3782_v57  ;;  %4299 = vmatprep.mubr.msk.bf16.mxu0 %vm973_vm11, %v3878_v52 }
 0x158   : > { %4204 = vmatmul.mubr.msk.bf16.vlgmr.msra.gmra.mrb[8].mxu1 %vm973_vm11, %v5807_v59  ;;  %4300 = vmatmul.mubr.msk.bf16.gmra.mrb[8].mxu0 %vm973_vm11, %v3879_v40 }
 0x159   : > { %4207 = vmatprep.mubr.msk.bf16.mxu1 %vm973_vm11, %v3784_v31  ;;  %4303 = vmatprep.mubr.msk.bf16.mxu0 %vm973_vm11, %v3880_v18 }
 0x160   : > { %4208 = vmatmul.mubr.msk.bf16.gmra.mrb[12].mxu1 %vm973_vm11, %v5843_v10  ;;  %4304 = vmatmul.mubr.msk.bf16.gmra.mrb[12].mxu0 %vm973_vm11, %v3881_v1 }
 0x20b   : > { %v4173_v36 = vpop.f32.mrb[0].mxu1 }
 0x20c   : > { %v1704_v59 = vpop.f32.mrb[1].mxu1 }
 0x20d   : > { %v4174_v60 = vpop.f32.mrb[2].mxu1 }
 0x20e   : > { %v1707_v53 = vpop.f32.mrb[3].mxu1 }
 0x213   : > { %v4177_v55 = vpop.f32.mrb[4].mxu1 }
 0x214   : > { %v1720_v48 = vpop.f32.mrb[5].mxu1 }
 0x215   : > { %v4178_v0 = vpop.f32.mrb[6].mxu1 }
 0x216   : > { %v1723_v25 = vpop.f32.mrb[7].mxu1 }
 0x21b   : > { %v4293_v30 = vpop.f32.mrb[0].mxu0 }
 0x21c   : > { %v4315_v34 = vadd.f32 %v4293_v30, %v4173_v36  ;;  %v3315_v47 = vpop.f32.mrb[1].mxu0 }
 0x21d   : > { %v4316_v7 = vadd.f32 %v3315_v47, %v1704_v59  ;;  %v4294_v10 = vpop.f32.mrb[2].mxu0 }
 0x21e   : > { %v3403_v22 = vadd.f32 %v4315_v34, %v5900_v2  ;;  %v4317_v32 = vadd.f32 %v4294_v10, %v4174_v60  ;;  %v3318_v20 = vpop.f32.mrb[3].mxu0 }
 0x21f   : > { %v3401_v58 = vadd.f32 %v4316_v7, %v5900_v2  ;;  %v4318_v50 = vadd.f32 %v3318_v20, %v1707_v53 }
 0x220   : > { %v3404_v56 = vadd.f32 %v4317_v32, %v5900_v2  ;;  %v3419_v5 = vmax.f32 %v3403_v22, 0.0 }
 0x221   : > { %v3402_v29 = vadd.f32 %v4318_v50, %v5900_v2  ;;  %v3417_v37 = vmax.f32 %v3401_v58, 0.0 }
 0x222   : > { %v3420_v17 = vmax.f32 %v3404_v56, 0.0 }
 0x223   : > { %v3418_v19 = vmax.f32 %v3402_v29, 0.0  ;;  %v4297_v43 = vpop.f32.mrb[4].mxu0 }
 0x224   : > { %v3944_v46 = vpack.c.bf16 %v3420_v17, %v3419_v5  ;;  %v4319_v45 = vadd.f32 %v4297_v43, %v4177_v55  ;;  %v3331_v26 = vpop.f32.mrb[5].mxu0 }
 0x225   : > { %v3939_v14 = vpack.c.bf16 %v3418_v19, %v3417_v37  ;;  %v4320_v3 = vadd.f32 %v3331_v26, %v1720_v48  ;;  %v4298_v21 = vpop.f32.mrb[6].mxu0 }
 0x226   : > { %3976 = vst [vmem:[%s5908_s30 + $0x8] sm:$0xff] %v3944_v46   ;;  %v3407_v38 = vadd.f32 %v4319_v45, %v5900_v2  ;;  %v4321_v39 = vadd.f32 %v4298_v21, %v4178_v0  ;;  %v3334_v8 = vpop.f32.mrb[7].mxu0 }
 0x227   : > { %3940 = vst [vmem:[%s5908_s30] sm:$0xff] %v3939_v14   ;;  %v3405_v23 = vadd.f32 %v4320_v3, %v5900_v2  ;;  %v4322_v57 = vadd.f32 %v3334_v8, %v1723_v25 }
 0x228   : > { %v3408_v52 = vadd.f32 %v4321_v39, %v5900_v2  ;;  %v3423_v11 = vmax.f32 %v3407_v38, 0.0 }
 0x229   : > { %v3406_v6 = vadd.f32 %v4322_v57, %v5900_v2  ;;  %v3421_v62 = vmax.f32 %v3405_v23, 0.0 }
 0x22a   : > { %v3424_v51 = vmax.f32 %v3408_v52, 0.0 }
 0x22b   : > { %v4205_v12 = vpop.f32.mrb[8].mxu1  ;;  %v3422_v33 = vmax.f32 %v3406_v6, 0.0  ;;  %v4301_v42 = vpop.f32.mrb[8].mxu0 }
 0x22c   : > { %v2146_v35 = vpop.f32.mrb[9].mxu1  ;;  %v3954_v44 = vpack.c.bf16 %v3424_v51, %v3423_v11  ;;  %v4323_v9 = vadd.f32 %v4301_v42, %v4205_v12  ;;  %v3347_v16 = vpop.f32.mrb[9].mxu0 }
 0x22d   : > { %v4206_v27 = vpop.f32.mrb[10].mxu1  ;;  %v3949_v54 = vpack.c.bf16 %v3422_v33, %v3421_v62  ;;  %v4324_v13 = vadd.f32 %v3347_v16, %v2146_v35  ;;  %v4302_v15 = vpop.f32.mrb[10].mxu0 }
 0x22e   : > { %v2149_v28 = vpop.f32.mrb[11].mxu1  ;;  %3978 = vst [vmem:[%s5908_s30 + $0x18] sm:$0xff] %v3954_v44   ;;  %v3411_v24 = vadd.f32 %v4323_v9, %v5900_v2  ;;  %v4325_v40 = vadd.f32 %v4302_v15, %v4206_v27  ;;  %v3350_v31 = vpop.f32.mrb[11].mxu0 }
 0x22f   : > { %3977 = vst [vmem:[%s5908_s30 + $0x10] sm:$0xff] %v3949_v54   ;;  %v3409_v18 = vadd.f32 %v4324_v13, %v5900_v2  ;;  %v4326_v4 = vadd.f32 %v3350_v31, %v2149_v28 }
 0x230   : > { %v3412_v61 = vadd.f32 %v4325_v40, %v5900_v2  ;;  %v3427_v41 = vmax.f32 %v3411_v24, 0.0 }
 0x231   : > { %v3410_v49 = vadd.f32 %v4326_v4, %v5900_v2  ;;  %v3425_v36 = vmax.f32 %v3409_v18, 0.0 }
 0x232   : > { %v3428_v63 = vmax.f32 %v3412_v61, 0.0 }
 0x233   : > { %v4209_v1 = vpop.f32.mrb[12].mxu1  ;;  %v3426_v59 = vmax.f32 %v3410_v49, 0.0  ;;  %v4305_v60 = vpop.f32.mrb[12].mxu0 }
 0x234   : > { %v2162_v53 = vpop.f32.mrb[13].mxu1  ;;  %v3964_v55 = vpack.c.bf16 %v3428_v63, %v3427_v41  ;;  %v4327_v48 = vadd.f32 %v4305_v60, %v4209_v1  ;;  %v3363_v0 = vpop.f32.mrb[13].mxu0 }
 0x235   : > { %v4210_v25 = vpop.f32.mrb[14].mxu1  ;;  %v3959_v30 = vpack.c.bf16 %v3426_v59, %v3425_v36  ;;  %v4328_v34 = vadd.f32 %v3363_v0, %v2162_v53  ;;  %v4306_v47 = vpop.f32.mrb[14].mxu0 }
 0x236   : > { %v2165_v7 = vpop.f32.mrb[15].mxu1  ;;  %3980 = vst [vmem:[%s5908_s30 + $0x28] sm:$0xff] %v3964_v55   ;;  %v3415_v10 = vadd.f32 %v4327_v48, %v5900_v2  ;;  %v4329_v22 = vadd.f32 %v4306_v47, %v4210_v25  ;;  %v3366_v32 = vpop.f32.mrb[15].mxu0 }
 0x237   : > { %3979 = vst [vmem:[%s5908_s30 + $0x20] sm:$0xff] %v3959_v30   ;;  %v3413_v20 = vadd.f32 %v4328_v34, %v5900_v2  ;;  %v4330_v58 = vadd.f32 %v3366_v32, %v2165_v7 }
 0x238   : > { %v3416_v50 = vadd.f32 %v4329_v22, %v5900_v2  ;;  %v3431_v29 = vmax.f32 %v3415_v10, 0.0 }
 0x239   : > { %v3414_v56 = vadd.f32 %v4330_v58, %v5900_v2  ;;  %v3429_v17 = vmax.f32 %v3413_v20, 0.0 }
 0x23a   : > { %v3432_v5 = vmax.f32 %v3416_v50, 0.0 }
 0x23b   : > { %v3430_v37 = vmax.f32 %v3414_v56, 0.0 }
 0x23c   : > { %v3974_v19 = vpack.c.bf16 %v3432_v5, %v3431_v29 }
 0x23d   : > { %v3969_v43 = vpack.c.bf16 %v3430_v37, %v3429_v17 }
 0x23e   : > { %3982 = vst [vmem:[%s5908_s30 + $0x38] sm:$0xff] %v3974_v19  }
 0x23f   : > { %3981 = vst [vmem:[%s5908_s30 + $0x30] sm:$0xff] %v3969_v43  }
 0x240   : > { %4692 = shalt.err (!%p4689_p8)
}
 0x241   : > { %s4693_s13 = scalar_lea.hbm %s5933_s14, 1024  ;;  %s4697_s0 = scalar_lea.hbm %s5990_s4, 2048 }
 0x242   : > { %p4694_p11 = scmp.ne.s32.totalorder %s5933_s14, %s4693_s13  ;;  %p4698_p6 = scmp.lt.u32.totalorder %s5933_s14, %s5990_s4 }
 0x243   : > { %p4699_p13 = scmp.lt.u32.totalorder %s4697_s0, %s4693_s13  ;;  %p4701_p5 = scmp.lt.u32.totalorder %s4693_s13, %s5933_s14 }
 0x244   : > { %p4695_p12 = pnand %p4694_p11, %p4899_p10 }
 0x245   : > { %p4700_p0 = por %p4699_p13, %p4698_p6 }
 0x246   : > { %p4696_p3 = pneg %p4695_p12 }
 0x247   : > { %p4702_p9 = por %p4701_p5, %p4700_p0 }
 0x249   : > { %p4703_p1 = pnand %p4702_p9, %p4696_p3 }
 0x24b   : > { %4706 = shalt.err (!%p4703_p1)
}
 0x24c   : > { %s4777_s8 = smov 64   ;;  %s4778_s21 = smov 4  }
 0x24d   : > { %4451 = dma.vmem_to_hbm [thread:$0]  (%p4899_p10), %s5935_s22, 1024, %s5933_s14, %s3514_s18, %s4777_s8, %s4777_s8, %s4778_s21  }
 0x24e PF: > { %s3545_s23 = sand.u32 1, %s4749_s15   ;;  %p6038_p2 = scmp.ne.s32.totalorder %s6002_s24, 0 }
 0x24f   : > { %p6039_p7 = scmp.ge.s32.totalorder %s4769_s20, 2  ;;  %s3546_s30 = scalar_lea.sflag [#allocation5], %s3545_s23 }
 0x251   : > { %p4465_p4 = pnand %p6039_p7, %p6038_p2 }
 0x253   : > { %4744 = dma.done.wait (!%p4465_p4), %s3546_s30, 1024  }
 0x254   : > { %4746 = vsyncadd (!%p4465_p4), %s3546_s30, 4294966272  ;;  %s23_s20 = sadd.s32 1, %s4769_s20   ;;  %s6040_s10 = sld [smem:[#allocation15_spill]] }
 0x255   : > { %p20_p8 = scmp.ge.s32.totalorder %s23_s20, 4   ;;  %s6041_s28 = sld [smem:[#allocation14_spill]] }
 0x256   : > { %s6042_s15 = smov %s4753_s16  ;;  %s6043_s16 = smov %s4757_s17 }
 0x257   : > { %s6045_s18 = smov %s4765_s19  ;;  %22 = sbr.rel (!%p20_p8) target bundleno = 11 (0xb), region = 114 }
 0x25a   : > { %s6044_s17 = smov %s6040_s10 }
 0x25b   : > { %s6046_s19 = smov %s6041_s28 }
 0x25e   :  { %3551 = vsyncpa [#allocation4], 1 }
 0x25f   :  { %3553 = vsyncpa [#allocation4 + $0x1], 1 }
 0x260   :  { %3554 = vsyncpa [#allocation7], 1 }
 0x261   :  { %3556 = vsyncpa [#allocation7 + $0x1], 1 }
 0x262   :  { %3557 = vsyncpa [#allocation5], 1 }
 0x263   :  { %3559 = vsyncpa [#allocation5 + $0x1], 1 }

</bundles_post_ra>
